<compile_context>
chip_gen: v7x
topology: tpu7x:2x2x1
jax: 0.10.0
libtpu: 0.0.40
codegen_flags: <defaults>
</compile_context>

<pallas_src>
import functools
import math

import jax
import jax.numpy as jnp
from jax.experimental import pallas as pl
from jax.experimental.pallas import tpu as pltpu

LANE = 128                        # TPU lane width
HALF = 64                         # half-lane: packed actor/critic head width
_DEFAULT_BATCH_TILE = 2048        # rows per grid step (amortizes ~0.35us/step)
_VMEM_LIMIT = 48 * 1024 * 1024    # headroom under v7x's 64 MiB physical VMEM


def _round_up(x, m):
    return ((x + m - 1) // m) * m


def _pick_batch_tile(batch, batch_tile=_DEFAULT_BATCH_TILE):
    """Row tile for the batch grid.  Guarantees >= 2 grid steps whenever
    batch > 128 so v7x's two TensorCores both get work; 128-row alignment
    keeps bf16 output blocks sublane-aligned.  Single full block for small
    batches (block == full array dim is always legal)."""
    if batch <= LANE:
        return batch
    half = _round_up((batch + 1) // 2, LANE)
    return max(LANE, min(batch_tile, half))


def _default_act_dtype():
    """bf16 activations on chips with a bf16 VPU/EUP (v6e / v7x); f32 on
    v5e and older generations (no bf16 VPU/EUP)."""
    try:
        kind = jax.devices()[0].device_kind.lower()
    except Exception:
        return jnp.float32
    if any(tag in kind for tag in ("v2", "v3", "v4", "v5")):
        return jnp.float32
    return jnp.bfloat16


# ----------------------------------------------------------------------------
# In-kernel MLP body: bf16 MXU matmuls with f32 accumulation, activation math
# (bias add / ELU / tanh) in `act_dtype` (bf16 on v6e/v7x, f32 on v5e).
# ----------------------------------------------------------------------------
def _run_mlp(x, wb_refs, num_layers, final_tanh, act_dtype, w0_rows=None):
    """x: (TB, K) activations.  wb_refs: [w0, b0, w1, b1, ...] VMEM refs
    (weights bf16, biases in act_dtype; output dims padded).  w0_rows: number
    of valid rows of W0 to use (static) when the obs block is narrower than
    the padded W0 (fallback path); None / full means use all rows."""
    h = x
    for l in range(num_layers):
        w_ref = wb_refs[2 * l]
        b_ref = wb_refs[2 * l + 1]
        if l == 0 and w0_rows is not None and w0_rows != w_ref.shape[0]:
            w = w_ref[:w0_rows, :]            # static sub-slice (fallback only)
        else:
            w = w_ref[...]
        h = jnp.dot(h.astype(w.dtype), w, preferred_element_type=jnp.float32)
        h = h.astype(act_dtype) + b_ref[...].astype(act_dtype)
        if l < num_layers - 1:
            # ELU(alpha=1); exp argument clamped so the untaken select branch
            # never overflows (EUP slot; ~expm1 for the range that matters).
            h = jnp.where(h > 0, h, jnp.exp(jnp.minimum(h, 0)) - 1)
    if final_tanh:
        h = jnp.tanh(h)
    return h


# ----------------------------------------------------------------------------
# Single-network kernel (actor OR critic), batch-tiled, bf16 padded output.
# ----------------------------------------------------------------------------
def _make_mlp_kernel(num_layers, w0_rows, final_tanh, act_dtype):
    def kernel(*refs):
        x_ref, out_ref = refs[0], refs[-1]
        wb = refs[1:-1]
        h = _run_mlp(x_ref[...], wb, num_layers, final_tanh, act_dtype, w0_rows)
        out_ref[...] = h.astype(out_ref.dtype)
    return kernel


@functools.partial(jax.jit,
                   static_argnames=("final_tanh", "act_dtype", "batch_tile"))
def mlp_forward(x, weights, biases, *, final_tanh=False,
                act_dtype=jnp.float32, batch_tile=_DEFAULT_BATCH_TILE):
    """One Pallas kernel per network; grid over batch; weights resident.
    Returns the PADDED bf16 output (slice the true columns in the consumer)."""
    num_layers = len(weights)
    batch, x_cols = x.shape
    k0 = weights[0].shape[0]              # padded fan-in of layer 0
    in_cols = min(k0, x_cols)             # columns DMA'd per obs row
    n_pad = weights[-1].shape[1]
    tb = _pick_batch_tile(batch, batch_tile)
    grid = (pl.cdiv(batch, tb),)

    in_specs = [pl.BlockSpec((tb, in_cols), lambda i: (i, 0))]
    args = [x]
    for w, b in zip(weights, biases):
        in_specs.append(pl.BlockSpec(w.shape, lambda i: (0, 0)))   # resident
        in_specs.append(pl.BlockSpec(b.shape, lambda i: (0, 0)))   # resident
        args += [w, b]

    return pl.pallas_call(
        _make_mlp_kernel(num_layers, in_cols, final_tanh, act_dtype),
        out_shape=jax.ShapeDtypeStruct((batch, n_pad), jnp.bfloat16),
        grid=grid,
        in_specs=in_specs,
        out_specs=pl.BlockSpec((tb, n_pad), lambda i: (i, 0)),
        compiler_params=pltpu.CompilerParams(
            dimension_semantics=("parallel",),
            vmem_limit_bytes=_VMEM_LIMIT),
    )(*args)


# ----------------------------------------------------------------------------
# Fused actor + critic kernel: one pallas_call, one packed (tb, 128) bf16
# output slab (actor head in lanes 0..63, critic head in lanes 64..127).
# ----------------------------------------------------------------------------
def _make_actor_critic_kernel(n_actor, n_critic, a_w0_rows, tanh_out, act_dtype):
    def kernel(*refs):
        obs_ref, cobs_ref = refs[0], refs[1]
        a_wb = refs[2:2 + 2 * n_actor]
        c_wb = refs[2 + 2 * n_actor:2 + 2 * (n_actor + n_critic)]
        out_ref = refs[-1]

        a = _run_mlp(obs_ref[...], a_wb, n_actor, tanh_out, act_dtype, a_w0_rows)
        c = _run_mlp(cobs_ref[...], c_wb, n_critic, False, act_dtype, None)
        out_ref[...] = jnp.concatenate(
            [a.astype(out_ref.dtype), c.astype(out_ref.dtype)], axis=-1)
    return kernel


@functools.partial(jax.jit,
                   static_argnames=("tanh_out", "act_dtype", "batch_tile"))
def actor_critic_forward(obs_all, critic_obs, actor_w, actor_b, critic_w,
                         critic_b, *, tanh_out=False, act_dtype=jnp.float32,
                         batch_tile=_DEFAULT_BATCH_TILE):
    """Fused actor+critic.  Returns packed (batch, 128) bf16:
    [:, :num_actions] = actions mean, [:, HALF] = value."""
    batch = obs_all.shape[0]
    a_k0 = actor_w[0].shape[0]
    a_cols = min(a_k0, obs_all.shape[1])          # lane-dense obs DMA width
    assert actor_w[-1].shape[1] == HALF and critic_w[-1].shape[1] == HALF
    tb = _pick_batch_tile(batch, batch_tile)
    grid = (pl.cdiv(batch, tb),)

    in_specs = [pl.BlockSpec((tb, a_cols), lambda i: (i, 0)),
                pl.BlockSpec((tb, critic_obs.shape[1]), lambda i: (i, 0))]
    args = [obs_all, critic_obs]
    for w, b in list(zip(actor_w, actor_b)) + list(zip(critic_w, critic_b)):
        in_specs.append(pl.BlockSpec(w.shape, lambda i: (0, 0)))
        in_specs.append(pl.BlockSpec(b.shape, lambda i: (0, 0)))
        args += [w, b]

    return pl.pallas_call(
        _make_actor_critic_kernel(len(actor_w), len(critic_w), a_cols,
                                  tanh_out, act_dtype),
        out_shape=jax.ShapeDtypeStruct((batch, 2 * HALF), jnp.bfloat16),
        grid=grid,
        in_specs=in_specs,
        out_specs=pl.BlockSpec((tb, 2 * HALF), lambda i: (i, 0)),
        compiler_params=pltpu.CompilerParams(
            dimension_semantics=("parallel",),
            vmem_limit_bytes=_VMEM_LIMIT),
    )(*args)


# ----------------------------------------------------------------------------
# Parameter construction (nn.Linear-style init) + padding / dtype casting.
# ----------------------------------------------------------------------------
def _init_linear(key, fan_in, fan_out):
    kw, kb = jax.random.split(key)
    bound = 1.0 / math.sqrt(fan_in)
    w = jax.random.uniform(kw, (fan_in, fan_out), jnp.float32, -bound, bound)
    b = jax.random.uniform(kb, (1, fan_out), jnp.float32, -bound, bound)
    return w, b


def _init_mlp(key, dims):
    ws, bs = [], []
    keys = jax.random.split(key, len(dims) - 1)
    for i in range(len(dims) - 1):
        w, b = _init_linear(keys[i], dims[i], dims[i + 1])
        ws.append(w)
        bs.append(b)
    return ws, bs


def _pad_mlp_params(ws, bs, *, k0_pad=None, final_align=LANE,
                    weight_dtype=jnp.bfloat16, bias_dtype=jnp.float32):
    """Zero-pad hidden output dims to multiples of 128 (lane-dense MXU) and the
    FINAL layer to a multiple of `final_align` (64 for packed heads).  The
    first layer's rows are padded to `k0_pad` so the obs DMA can be a full
    128-lane block (zero rows nullify the extra obs columns).  Weights -> bf16
    for the MXU; biases -> the activation dtype."""
    pws, pbs = [], []
    prev = k0_pad if k0_pad is not None else ws[0].shape[0]
    n_layers = len(ws)
    for idx, (w, b) in enumerate(zip(ws, bs)):
        k, n = w.shape
        assert k <= prev
        align = final_align if idx == n_layers - 1 else LANE
        n_pad = _round_up(n, align)
        wp = jnp.zeros((prev, n_pad), jnp.float32).at[:k, :n].set(w)
        bp = jnp.zeros((1, n_pad), jnp.float32).at[:, :n].set(b)
        pws.append(wp.astype(weight_dtype))
        pbs.append(bp.astype(bias_dtype))
        prev = n_pad
    return pws, pbs


# ----------------------------------------------------------------------------
# ActorCritic wrapper (forward-pass semantics of the PyTorch module)
# ----------------------------------------------------------------------------
class ActorCriticPallas:
    is_recurrent = False

    def __init__(self, num_prop, num_critic_obs, num_priv_latent, num_hist,
                 num_actions, actor_hidden_dims=(256, 256, 256),
                 critic_hidden_dims=(256, 256, 256), activation="elu",
                 init_noise_std=1.0, fix_action_std=False, *, key,
                 priv_encoder_dims=(), tanh_encoder_output=False,
                 batch_tile=_DEFAULT_BATCH_TILE, act_dtype=None):
        assert activation == "elu"        # kernel implements ELU (module default)
        # TODO(synk): >64 actions needs an unpacked (two-output) fused kernel.
        assert num_actions <= HALF
        self.num_prop = num_prop
        self.num_actions = num_actions
        self.tanh_encoder_output = tanh_encoder_output
        self.batch_tile = batch_tile
        self.act_dtype = act_dtype if act_dtype is not None else _default_act_dtype()

        k_actor, k_critic = jax.random.split(key)
        aw, ab = _init_mlp(k_actor, [num_prop, *actor_hidden_dims, num_actions])
        cw, cb = _init_mlp(k_critic, [num_critic_obs, *critic_hidden_dims, 1])
        # f32 masters (reference check); padded bf16 kernel params.
        self.actor_w_f32, self.actor_b_f32 = aw, ab
        self.critic_w_f32, self.critic_b_f32 = cw, cb
        self.actor_w, self.actor_b = _pad_mlp_params(
            aw, ab, k0_pad=_round_up(num_prop, LANE), final_align=HALF,
            bias_dtype=self.act_dtype)
        self.critic_w, self.critic_b = _pad_mlp_params(
            cw, cb, k0_pad=None, final_align=HALF, bias_dtype=self.act_dtype)

        if fix_action_std:
            # TODO(synk): fixed-std table in the reference is hard-coded for 18
            # actions; only the learnable-std path is exercised here.
            self.std = jnp.asarray(
                [0.3, 0.3, 0.3, 0.4, 0.2] * 2 + [0.25] * 3 + [0.5] * 8,
                jnp.float32)
        else:
            self.std = init_noise_std * jnp.ones((num_actions,), jnp.float32)

    # Actor.forward (proprio slice handled by zero-padded W0 rows + 128-col DMA).
    def act_inference(self, observations):
        out = mlp_forward(observations, self.actor_w, self.actor_b,
                          final_tanh=self.tanh_encoder_output,
                          act_dtype=self.act_dtype, batch_tile=self.batch_tile)
        return out[:, :self.num_actions].astype(jnp.float32)

    # update_distribution: mean = actor(obs), std broadcast to mean's shape.
    def update_distribution(self, observations):
        mean = self.act_inference(observations)
        std = jnp.broadcast_to(self.std, mean.shape)
        return mean, std

    # act: sample from Normal(mean, std) (torch distribution.sample()).
    def act(self, observations, key):
        mean, std = self.update_distribution(observations)
        return mean + std * jax.random.normal(key, mean.shape, mean.dtype)

    # critic forward.
    def evaluate(self, critic_observations):
        out = mlp_forward(critic_observations, self.critic_w, self.critic_b,
                          final_tanh=False, act_dtype=self.act_dtype,
                          batch_tile=self.batch_tile)
        return out[:, :1].astype(jnp.float32)

    # Fused actor+critic: one pallas_call, one packed bf16 output slab.
    # Downstream consumers should slice the packed slab inside their own jit.
    def act_and_evaluate_packed(self, observations, critic_observations):
        return actor_critic_forward(
            observations, critic_observations,
            self.actor_w, self.actor_b, self.critic_w, self.critic_b,
            tanh_out=self.tanh_encoder_output, act_dtype=self.act_dtype,
            batch_tile=self.batch_tile)

    def act_and_evaluate(self, observations, critic_observations):
        packed = self.act_and_evaluate_packed(observations, critic_observations)
        mean = packed[:, :self.num_actions].astype(jnp.float32)
        value = packed[:, HALF:HALF + 1].astype(jnp.float32)
        return mean, value


# ----------------------------------------------------------------------------
# Pure-JAX reference mirroring the kernel numerics (bf16 weights at the MXU,
# f32 accumulation, activations in act_dtype, bf16 output writeback).
# ----------------------------------------------------------------------------
def _mlp_ref(x, ws_f32, bs_f32, in_cols, act_dtype, final_tanh=False):
    h = x[:, :in_cols]
    for i, (w, b) in enumerate(zip(ws_f32, bs_f32)):
        h = jnp.dot(h.astype(jnp.bfloat16), w.astype(jnp.bfloat16),
                    preferred_element_type=jnp.float32)
        h = h.astype(act_dtype) + b.astype(act_dtype)
        if i < len(ws_f32) - 1:
            h = jnp.where(h > 0, h, jnp.exp(jnp.minimum(h, 0)) - 1)
    if final_tanh:
        h = jnp.tanh(h)
    return h.astype(jnp.bfloat16).astype(jnp.float32)


if __name__ == "__main__":
    key = jax.random.PRNGKey(0)
    k_params, k_obs, k_cobs = jax.random.split(key, 3)

    # Small but layout-exercising sizes: 2 batch tiles (128 rows each), 128-wide
    # hidden layers, lane-dense first-layer DMA (48 -> 128 padded rows), packed
    # 64+64-lane bf16 output slab.
    batch = 256
    num_prop = 48
    num_priv_latent = 8
    num_hist = 2
    num_actions = 12
    num_obs_all = num_prop + num_priv_latent + num_hist * num_prop   # 152 cols
    num_critic_obs = 64

    model = ActorCriticPallas(
        num_prop=num_prop,
        num_critic_obs=num_critic_obs,
        num_priv_latent=num_priv_latent,
        num_hist=num_hist,
        num_actions=num_actions,
        actor_hidden_dims=(128, 128, 128),   # on v6e/v7x, prefer multiples of 256
        critic_hidden_dims=(128, 128, 128),
        activation="elu",
        init_noise_std=1.0,
        key=k_params,
        priv_encoder_dims=(),
        tanh_encoder_output=False,
    )

    obs_all = jax.random.normal(k_obs, (batch, num_obs_all), jnp.float32)
    critic_obs = jax.random.normal(k_cobs, (batch, num_critic_obs), jnp.float32)

    # Fused actor+critic (single pallas_call, single packed bf16 output).
    actions_mean, value = model.act_and_evaluate(obs_all, critic_obs)
    # Separate module-API paths.
    mean_sep, std = model.update_distribution(obs_all)
    value_sep = model.evaluate(critic_obs)
    jax.block_until_ready((actions_mean, value, mean_sep, std, value_sep))

    # Reference check (mirrors kernel numerics, including activation dtype).
    adt = model.act_dtype
    mean_ref = _mlp_ref(obs_all, model.actor_w_f32, model.actor_b_f32,
                        num_prop, adt)
    value_ref = _mlp_ref(critic_obs, model.critic_w_f32, model.critic_b_f32,
                         num_critic_obs, adt)

    assert actions_mean.shape == (batch, num_actions)
    assert value.shape == (batch, 1)
    assert jnp.allclose(actions_mean, mean_ref, atol=3e-2, rtol=3e-2)
    assert jnp.allclose(value, value_ref, atol=3e-2, rtol=3e-2)
    assert jnp.allclose(mean_sep, mean_ref, atol=3e-2, rtol=3e-2)
    assert jnp.allclose(value_sep, value_ref, atol=3e-2, rtol=3e-2)
    assert jnp.allclose(std, jnp.ones((batch, num_actions), jnp.float32))

    print("KERNEL_OK")
</pallas_src>

<mosaic_0001>
module attributes {stable_mosaic.version = 11 : i64} {
  func.func @kernel(%arg0: i32, %arg1: memref<128x128xf32, #tpu.memory_space<vmem>>, %arg2: memref<128x64xf32, #tpu.memory_space<vmem>>, %arg3: memref<128x128xbf16, #tpu.memory_space<vmem>>, %arg4: memref<1x128xbf16, #tpu.memory_space<vmem>>, %arg5: memref<128x128xbf16, #tpu.memory_space<vmem>>, %arg6: memref<1x128xbf16, #tpu.memory_space<vmem>>, %arg7: memref<128x128xbf16, #tpu.memory_space<vmem>>, %arg8: memref<1x128xbf16, #tpu.memory_space<vmem>>, %arg9: memref<128x64xbf16, #tpu.memory_space<vmem>>, %arg10: memref<1x64xbf16, #tpu.memory_space<vmem>>, %arg11: memref<64x128xbf16, #tpu.memory_space<vmem>>, %arg12: memref<1x128xbf16, #tpu.memory_space<vmem>>, %arg13: memref<128x128xbf16, #tpu.memory_space<vmem>>, %arg14: memref<1x128xbf16, #tpu.memory_space<vmem>>, %arg15: memref<128x128xbf16, #tpu.memory_space<vmem>>, %arg16: memref<1x128xbf16, #tpu.memory_space<vmem>>, %arg17: memref<128x64xbf16, #tpu.memory_space<vmem>>, %arg18: memref<1x64xbf16, #tpu.memory_space<vmem>>, %arg19: memref<128x128xbf16, #tpu.memory_space<vmem>>) attributes {dimension_semantics = [#tpu.dimension_semantics<parallel>], iteration_bounds = array<i64: 2>, scalar_prefetch = 0 : i64, scratch_operands = 0 : i64, tpu.core_type = #tpu.core_type<tc>, window_params = [{transform_indices = @transform_0, window_bounds = array<i64: 128, 128>}, {transform_indices = @transform_1, window_bounds = array<i64: 128, 64>}, {pipeline_mode = #tpu.pipeline_mode<synchronous>, transform_indices = @transform_2, window_bounds = array<i64: 128, 128>}, {pipeline_mode = #tpu.pipeline_mode<synchronous>, transform_indices = @transform_3, window_bounds = array<i64: 1, 128>}, {pipeline_mode = #tpu.pipeline_mode<synchronous>, transform_indices = @transform_4, window_bounds = array<i64: 128, 128>}, {pipeline_mode = #tpu.pipeline_mode<synchronous>, transform_indices = @transform_5, window_bounds = array<i64: 1, 128>}, {pipeline_mode = #tpu.pipeline_mode<synchronous>, transform_indices = @transform_6, window_bounds = array<i64: 128, 128>}, {pipeline_mode = #tpu.pipeline_mode<synchronous>, transform_indices = @transform_7, window_bounds = array<i64: 1, 128>}, {pipeline_mode = #tpu.pipeline_mode<synchronous>, transform_indices = @transform_8, window_bounds = array<i64: 128, 64>}, {pipeline_mode = #tpu.pipeline_mode<synchronous>, transform_indices = @transform_9, window_bounds = array<i64: 1, 64>}, {pipeline_mode = #tpu.pipeline_mode<synchronous>, transform_indices = @transform_10, window_bounds = array<i64: 64, 128>}, {pipeline_mode = #tpu.pipeline_mode<synchronous>, transform_indices = @transform_11, window_bounds = array<i64: 1, 128>}, {pipeline_mode = #tpu.pipeline_mode<synchronous>, transform_indices = @transform_12, window_bounds = array<i64: 128, 128>}, {pipeline_mode = #tpu.pipeline_mode<synchronous>, transform_indices = @transform_13, window_bounds = array<i64: 1, 128>}, {pipeline_mode = #tpu.pipeline_mode<synchronous>, transform_indices = @transform_14, window_bounds = array<i64: 128, 128>}, {pipeline_mode = #tpu.pipeline_mode<synchronous>, transform_indices = @transform_15, window_bounds = array<i64: 1, 128>}, {pipeline_mode = #tpu.pipeline_mode<synchronous>, transform_indices = @transform_16, window_bounds = array<i64: 128, 64>}, {pipeline_mode = #tpu.pipeline_mode<synchronous>, transform_indices = @transform_17, window_bounds = array<i64: 1, 64>}, {transform_indices = @transform_18, window_bounds = array<i64: 128, 128>}]} {
    %c0 = arith.constant 0 : index
    %c0_0 = arith.constant 0 : index
    %0 = vector.load %arg1[%c0, %c0_0] : memref<128x128xf32, #tpu.memory_space<vmem>>, vector<128x128xf32>
    %c0_1 = arith.constant 0 : index
    %c0_2 = arith.constant 0 : index
    %1 = vector.load %arg3[%c0_1, %c0_2] : memref<128x128xbf16, #tpu.memory_space<vmem>>, vector<128x128xbf16>
    %2 = arith.truncf %0 : vector<128x128xf32> to vector<128x128xbf16>
    %cst = arith.constant dense<0.000000e+00> : vector<128x128xf32>
    %3 = tpu.matmul %2, %1, %cst {dimension_numbers = #tpu.dot_dimension_numbers<[1], [0], [0], [1], [0, 0, 1, 1], [], []>} : vector<128x128xbf16>, vector<128x128xbf16>, vector<128x128xf32> -> vector<128x128xf32>
    %4 = arith.truncf %3 : vector<128x128xf32> to vector<128x128xbf16>
    %c0_3 = arith.constant 0 : index
    %c0_4 = arith.constant 0 : index
    %5 = vector.load %arg4[%c0_3, %c0_4] : memref<1x128xbf16, #tpu.memory_space<vmem>>, vector<1x128xbf16>
    %6 = vector.broadcast %5 : vector<1x128xbf16> to vector<128x128xbf16>
    %7 = arith.addf %4, %6 : vector<128x128xbf16>
    %cst_5 = arith.constant 0.000000e+00 : bf16
    %8 = vector.broadcast %cst_5 : bf16 to vector<128x128xbf16>
    %9 = arith.cmpf ogt, %7, %8 : vector<128x128xbf16>
    %cst_6 = arith.constant 0.000000e+00 : bf16
    %10 = vector.broadcast %cst_6 : bf16 to vector<128x128xbf16>
    %11 = arith.minimumf %7, %10 : vector<128x128xbf16>
    %12 = math.exp %11 : vector<128x128xbf16>
    %cst_7 = arith.constant 1.000000e+00 : bf16
    %13 = vector.broadcast %cst_7 : bf16 to vector<128x128xbf16>
    %14 = arith.subf %12, %13 : vector<128x128xbf16>
    %15 = arith.select %9, %7, %14 : vector<128x128xi1>, vector<128x128xbf16>
    %c0_8 = arith.constant 0 : index
    %c0_9 = arith.constant 0 : index
    %16 = vector.load %arg5[%c0_8, %c0_9] : memref<128x128xbf16, #tpu.memory_space<vmem>>, vector<128x128xbf16>
    %cst_10 = arith.constant dense<0.000000e+00> : vector<128x128xf32>
    %17 = tpu.matmul %15, %16, %cst_10 {dimension_numbers = #tpu.dot_dimension_numbers<[1], [0], [0], [1], [0, 0, 1, 1], [], []>} : vector<128x128xbf16>, vector<128x128xbf16>, vector<128x128xf32> -> vector<128x128xf32>
    %18 = arith.truncf %17 : vector<128x128xf32> to vector<128x128xbf16>
    %c0_11 = arith.constant 0 : index
    %c0_12 = arith.constant 0 : index
    %19 = vector.load %arg6[%c0_11, %c0_12] : memref<1x128xbf16, #tpu.memory_space<vmem>>, vector<1x128xbf16>
    %20 = vector.broadcast %19 : vector<1x128xbf16> to vector<128x128xbf16>
    %21 = arith.addf %18, %20 : vector<128x128xbf16>
    %cst_13 = arith.constant 0.000000e+00 : bf16
    %22 = vector.broadcast %cst_13 : bf16 to vector<128x128xbf16>
    %23 = arith.cmpf ogt, %21, %22 : vector<128x128xbf16>
    %cst_14 = arith.constant 0.000000e+00 : bf16
    %24 = vector.broadcast %cst_14 : bf16 to vector<128x128xbf16>
    %25 = arith.minimumf %21, %24 : vector<128x128xbf16>
    %26 = math.exp %25 : vector<128x128xbf16>
    %cst_15 = arith.constant 1.000000e+00 : bf16
    %27 = vector.broadcast %cst_15 : bf16 to vector<128x128xbf16>
    %28 = arith.subf %26, %27 : vector<128x128xbf16>
    %29 = arith.select %23, %21, %28 : vector<128x128xi1>, vector<128x128xbf16>
    %c0_16 = arith.constant 0 : index
    %c0_17 = arith.constant 0 : index
    %30 = vector.load %arg7[%c0_16, %c0_17] : memref<128x128xbf16, #tpu.memory_space<vmem>>, vector<128x128xbf16>
    %cst_18 = arith.constant dense<0.000000e+00> : vector<128x128xf32>
    %31 = tpu.matmul %29, %30, %cst_18 {dimension_numbers = #tpu.dot_dimension_numbers<[1], [0], [0], [1], [0, 0, 1, 1], [], []>} : vector<128x128xbf16>, vector<128x128xbf16>, vector<128x128xf32> -> vector<128x128xf32>
    %32 = arith.truncf %31 : vector<128x128xf32> to vector<128x128xbf16>
    %c0_19 = arith.constant 0 : index
    %c0_20 = arith.constant 0 : index
    %33 = vector.load %arg8[%c0_19, %c0_20] : memref<1x128xbf16, #tpu.memory_space<vmem>>, vector<1x128xbf16>
    %34 = vector.broadcast %33 : vector<1x128xbf16> to vector<128x128xbf16>
    %35 = arith.addf %32, %34 : vector<128x128xbf16>
    %cst_21 = arith.constant 0.000000e+00 : bf16
    %36 = vector.broadcast %cst_21 : bf16 to vector<128x128xbf16>
    %37 = arith.cmpf ogt, %35, %36 : vector<128x128xbf16>
    %cst_22 = arith.constant 0.000000e+00 : bf16
    %38 = vector.broadcast %cst_22 : bf16 to vector<128x128xbf16>
    %39 = arith.minimumf %35, %38 : vector<128x128xbf16>
    %40 = math.exp %39 : vector<128x128xbf16>
    %cst_23 = arith.constant 1.000000e+00 : bf16
    %41 = vector.broadcast %cst_23 : bf16 to vector<128x128xbf16>
    %42 = arith.subf %40, %41 : vector<128x128xbf16>
    %43 = arith.select %37, %35, %42 : vector<128x128xi1>, vector<128x128xbf16>
    %c0_24 = arith.constant 0 : index
    %c0_25 = arith.constant 0 : index
    %44 = vector.load %arg9[%c0_24, %c0_25] : memref<128x64xbf16, #tpu.memory_space<vmem>>, vector<128x64xbf16>
    %cst_26 = arith.constant dense<0.000000e+00> : vector<128x64xf32>
    %45 = tpu.matmul %43, %44, %cst_26 {dimension_numbers = #tpu.dot_dimension_numbers<[1], [0], [0], [1], [0, 0, 1, 1], [], []>} : vector<128x128xbf16>, vector<128x64xbf16>, vector<128x64xf32> -> vector<128x64xf32>
    %46 = arith.truncf %45 : vector<128x64xf32> to vector<128x64xbf16>
    %c0_27 = arith.constant 0 : index
    %c0_28 = arith.constant 0 : index
    %47 = vector.load %arg10[%c0_27, %c0_28] : memref<1x64xbf16, #tpu.memory_space<vmem>>, vector<1x64xbf16>
    %48 = vector.broadcast %47 : vector<1x64xbf16> to vector<128x64xbf16>
    %49 = arith.addf %46, %48 : vector<128x64xbf16>
    %c0_29 = arith.constant 0 : index
    %c0_30 = arith.constant 0 : index
    %50 = vector.load %arg2[%c0_29, %c0_30] : memref<128x64xf32, #tpu.memory_space<vmem>>, vector<128x64xf32>
    %c0_31 = arith.constant 0 : index
    %c0_32 = arith.constant 0 : index
    %51 = vector.load %arg11[%c0_31, %c0_32] : memref<64x128xbf16, #tpu.memory_space<vmem>>, vector<64x128xbf16>
    %52 = arith.truncf %50 : vector<128x64xf32> to vector<128x64xbf16>
    %cst_33 = arith.constant dense<0.000000e+00> : vector<128x128xf32>
    %53 = tpu.matmul %52, %51, %cst_33 {dimension_numbers = #tpu.dot_dimension_numbers<[1], [0], [0], [1], [0, 0, 1, 1], [], []>} : vector<128x64xbf16>, vector<64x128xbf16>, vector<128x128xf32> -> vector<128x128xf32>
    %54 = arith.truncf %53 : vector<128x128xf32> to vector<128x128xbf16>
    %c0_34 = arith.constant 0 : index
    %c0_35 = arith.constant 0 : index
    %55 = vector.load %arg12[%c0_34, %c0_35] : memref<1x128xbf16, #tpu.memory_space<vmem>>, vector<1x128xbf16>
    %56 = vector.broadcast %55 : vector<1x128xbf16> to vector<128x128xbf16>
    %57 = arith.addf %54, %56 : vector<128x128xbf16>
    %cst_36 = arith.constant 0.000000e+00 : bf16
    %58 = vector.broadcast %cst_36 : bf16 to vector<128x128xbf16>
    %59 = arith.cmpf ogt, %57, %58 : vector<128x128xbf16>
    %cst_37 = arith.constant 0.000000e+00 : bf16
    %60 = vector.broadcast %cst_37 : bf16 to vector<128x128xbf16>
    %61 = arith.minimumf %57, %60 : vector<128x128xbf16>
    %62 = math.exp %61 : vector<128x128xbf16>
    %cst_38 = arith.constant 1.000000e+00 : bf16
    %63 = vector.broadcast %cst_38 : bf16 to vector<128x128xbf16>
    %64 = arith.subf %62, %63 : vector<128x128xbf16>
    %65 = arith.select %59, %57, %64 : vector<128x128xi1>, vector<128x128xbf16>
    %c0_39 = arith.constant 0 : index
    %c0_40 = arith.constant 0 : index
    %66 = vector.load %arg13[%c0_39, %c0_40] : memref<128x128xbf16, #tpu.memory_space<vmem>>, vector<128x128xbf16>
    %cst_41 = arith.constant dense<0.000000e+00> : vector<128x128xf32>
    %67 = tpu.matmul %65, %66, %cst_41 {dimension_numbers = #tpu.dot_dimension_numbers<[1], [0], [0], [1], [0, 0, 1, 1], [], []>} : vector<128x128xbf16>, vector<128x128xbf16>, vector<128x128xf32> -> vector<128x128xf32>
    %68 = arith.truncf %67 : vector<128x128xf32> to vector<128x128xbf16>
    %c0_42 = arith.constant 0 : index
    %c0_43 = arith.constant 0 : index
    %69 = vector.load %arg14[%c0_42, %c0_43] : memref<1x128xbf16, #tpu.memory_space<vmem>>, vector<1x128xbf16>
    %70 = vector.broadcast %69 : vector<1x128xbf16> to vector<128x128xbf16>
    %71 = arith.addf %68, %70 : vector<128x128xbf16>
    %cst_44 = arith.constant 0.000000e+00 : bf16
    %72 = vector.broadcast %cst_44 : bf16 to vector<128x128xbf16>
    %73 = arith.cmpf ogt, %71, %72 : vector<128x128xbf16>
    %cst_45 = arith.constant 0.000000e+00 : bf16
    %74 = vector.broadcast %cst_45 : bf16 to vector<128x128xbf16>
    %75 = arith.minimumf %71, %74 : vector<128x128xbf16>
    %76 = math.exp %75 : vector<128x128xbf16>
    %cst_46 = arith.constant 1.000000e+00 : bf16
    %77 = vector.broadcast %cst_46 : bf16 to vector<128x128xbf16>
    %78 = arith.subf %76, %77 : vector<128x128xbf16>
    %79 = arith.select %73, %71, %78 : vector<128x128xi1>, vector<128x128xbf16>
    %c0_47 = arith.constant 0 : index
    %c0_48 = arith.constant 0 : index
    %80 = vector.load %arg15[%c0_47, %c0_48] : memref<128x128xbf16, #tpu.memory_space<vmem>>, vector<128x128xbf16>
    %cst_49 = arith.constant dense<0.000000e+00> : vector<128x128xf32>
    %81 = tpu.matmul %79, %80, %cst_49 {dimension_numbers = #tpu.dot_dimension_numbers<[1], [0], [0], [1], [0, 0, 1, 1], [], []>} : vector<128x128xbf16>, vector<128x128xbf16>, vector<128x128xf32> -> vector<128x128xf32>
    %82 = arith.truncf %81 : vector<128x128xf32> to vector<128x128xbf16>
    %c0_50 = arith.constant 0 : index
    %c0_51 = arith.constant 0 : index
    %83 = vector.load %arg16[%c0_50, %c0_51] : memref<1x128xbf16, #tpu.memory_space<vmem>>, vector<1x128xbf16>
    %84 = vector.broadcast %83 : vector<1x128xbf16> to vector<128x128xbf16>
    %85 = arith.addf %82, %84 : vector<128x128xbf16>
    %cst_52 = arith.constant 0.000000e+00 : bf16
    %86 = vector.broadcast %cst_52 : bf16 to vector<128x128xbf16>
    %87 = arith.cmpf ogt, %85, %86 : vector<128x128xbf16>
    %cst_53 = arith.constant 0.000000e+00 : bf16
    %88 = vector.broadcast %cst_53 : bf16 to vector<128x128xbf16>
    %89 = arith.minimumf %85, %88 : vector<128x128xbf16>
    %90 = math.exp %89 : vector<128x128xbf16>
    %cst_54 = arith.constant 1.000000e+00 : bf16
    %91 = vector.broadcast %cst_54 : bf16 to vector<128x128xbf16>
    %92 = arith.subf %90, %91 : vector<128x128xbf16>
    %93 = arith.select %87, %85, %92 : vector<128x128xi1>, vector<128x128xbf16>
    %c0_55 = arith.constant 0 : index
    %c0_56 = arith.constant 0 : index
    %94 = vector.load %arg17[%c0_55, %c0_56] : memref<128x64xbf16, #tpu.memory_space<vmem>>, vector<128x64xbf16>
    %cst_57 = arith.constant dense<0.000000e+00> : vector<128x64xf32>
    %95 = tpu.matmul %93, %94, %cst_57 {dimension_numbers = #tpu.dot_dimension_numbers<[1], [0], [0], [1], [0, 0, 1, 1], [], []>} : vector<128x128xbf16>, vector<128x64xbf16>, vector<128x64xf32> -> vector<128x64xf32>
    %96 = arith.truncf %95 : vector<128x64xf32> to vector<128x64xbf16>
    %c0_58 = arith.constant 0 : index
    %c0_59 = arith.constant 0 : index
    %97 = vector.load %arg18[%c0_58, %c0_59] : memref<1x64xbf16, #tpu.memory_space<vmem>>, vector<1x64xbf16>
    %98 = vector.broadcast %97 : vector<1x64xbf16> to vector<128x64xbf16>
    %99 = arith.addf %96, %98 : vector<128x64xbf16>
    %100 = tpu.concatenate %49, %99 in 1 : vector<128x64xbf16>, vector<128x64xbf16> -> vector<128x128xbf16>
    %c0_60 = arith.constant 0 : index
    %c0_61 = arith.constant 0 : index
    %101 = vector.load %arg19[%c0_60, %c0_61] : memref<128x128xbf16, #tpu.memory_space<vmem>>, vector<128x128xbf16>
    tpu.vector_store %arg19[%c0_60, %c0_61], %100 {strides = array<i32>} : memref<128x128xbf16, #tpu.memory_space<vmem>>, vector<128x128xbf16>,
    return
  }
  func.func @transform_0(%arg0: i32) -> (i32, i32) {
    %c0_i32 = arith.constant 0 : i32
    %c0_i32_0 = arith.constant 0 : i32
    return %arg0, %c0_i32 : i32, i32
  }
  func.func @transform_1(%arg0: i32) -> (i32, i32) {
    %c0_i32 = arith.constant 0 : i32
    %c0_i32_0 = arith.constant 0 : i32
    return %arg0, %c0_i32 : i32, i32
  }
  func.func @transform_2(%arg0: i32) -> (i32, i32) {
    %c0_i32 = arith.constant 0 : i32
    %c0_i32_0 = arith.constant 0 : i32
    %c0_i32_1 = arith.constant 0 : i32
    return %c0_i32, %c0_i32_0 : i32, i32
  }
  func.func @transform_3(%arg0: i32) -> (i32, i32) {
    %c0_i32 = arith.constant 0 : i32
    %c0_i32_0 = arith.constant 0 : i32
    %c0_i32_1 = arith.constant 0 : i32
    return %c0_i32, %c0_i32_0 : i32, i32
  }
  func.func @transform_4(%arg0: i32) -> (i32, i32) {
    %c0_i32 = arith.constant 0 : i32
    %c0_i32_0 = arith.constant 0 : i32
    %c0_i32_1 = arith.constant 0 : i32
    return %c0_i32, %c0_i32_0 : i32, i32
  }
  func.func @transform_5(%arg0: i32) -> (i32, i32) {
    %c0_i32 = arith.constant 0 : i32
    %c0_i32_0 = arith.constant 0 : i32
    %c0_i32_1 = arith.constant 0 : i32
    return %c0_i32, %c0_i32_0 : i32, i32
  }
  func.func @transform_6(%arg0: i32) -> (i32, i32) {
    %c0_i32 = arith.constant 0 : i32
    %c0_i32_0 = arith.constant 0 : i32
    %c0_i32_1 = arith.constant 0 : i32
    return %c0_i32, %c0_i32_0 : i32, i32
  }
  func.func @transform_7(%arg0: i32) -> (i32, i32) {
    %c0_i32 = arith.constant 0 : i32
    %c0_i32_0 = arith.constant 0 : i32
    %c0_i32_1 = arith.constant 0 : i32
    return %c0_i32, %c0_i32_0 : i32, i32
  }
  func.func @transform_8(%arg0: i32) -> (i32, i32) {
    %c0_i32 = arith.constant 0 : i32
    %c0_i32_0 = arith.constant 0 : i32
    %c0_i32_1 = arith.constant 0 : i32
    return %c0_i32, %c0_i32_0 : i32, i32
  }
  func.func @transform_9(%arg0: i32) -> (i32, i32) {
    %c0_i32 = arith.constant 0 : i32
    %c0_i32_0 = arith.constant 0 : i32
    %c0_i32_1 = arith.constant 0 : i32
    return %c0_i32, %c0_i32_0 : i32, i32
  }
  func.func @transform_10(%arg0: i32) -> (i32, i32) {
    %c0_i32 = arith.constant 0 : i32
    %c0_i32_0 = arith.constant 0 : i32
    %c0_i32_1 = arith.constant 0 : i32
    return %c0_i32, %c0_i32_0 : i32, i32
  }
  func.func @transform_11(%arg0: i32) -> (i32, i32) {
    %c0_i32 = arith.constant 0 : i32
    %c0_i32_0 = arith.constant 0 : i32
    %c0_i32_1 = arith.constant 0 : i32
    return %c0_i32, %c0_i32_0 : i32, i32
  }
  func.func @transform_12(%arg0: i32) -> (i32, i32) {
    %c0_i32 = arith.constant 0 : i32
    %c0_i32_0 = arith.constant 0 : i32
    %c0_i32_1 = arith.constant 0 : i32
    return %c0_i32, %c0_i32_0 : i32, i32
  }
  func.func @transform_13(%arg0: i32) -> (i32, i32) {
    %c0_i32 = arith.constant 0 : i32
    %c0_i32_0 = arith.constant 0 : i32
    %c0_i32_1 = arith.constant 0 : i32
    return %c0_i32, %c0_i32_0 : i32, i32
  }
  func.func @transform_14(%arg0: i32) -> (i32, i32) {
    %c0_i32 = arith.constant 0 : i32
    %c0_i32_0 = arith.constant 0 : i32
    %c0_i32_1 = arith.constant 0 : i32
    return %c0_i32, %c0_i32_0 : i32, i32
  }
  func.func @transform_15(%arg0: i32) -> (i32, i32) {
    %c0_i32 = arith.constant 0 : i32
    %c0_i32_0 = arith.constant 0 : i32
    %c0_i32_1 = arith.constant 0 : i32
    return %c0_i32, %c0_i32_0 : i32, i32
  }
  func.func @transform_16(%arg0: i32) -> (i32, i32) {
    %c0_i32 = arith.constant 0 : i32
    %c0_i32_0 = arith.constant 0 : i32
    %c0_i32_1 = arith.constant 0 : i32
    return %c0_i32, %c0_i32_0 : i32, i32
  }
  func.func @transform_17(%arg0: i32) -> (i32, i32) {
    %c0_i32 = arith.constant 0 : i32
    %c0_i32_0 = arith.constant 0 : i32
    %c0_i32_1 = arith.constant 0 : i32
    return %c0_i32, %c0_i32_0 : i32, i32
  }
  func.func @transform_18(%arg0: i32) -> (i32, i32) {
    %c0_i32 = arith.constant 0 : i32
    %c0_i32_0 = arith.constant 0 : i32
    return %arg0, %c0_i32 : i32, i32
  }
}

</mosaic_0001>

<bundles_post_ra>
// kernel: actor_critic_forward.1
= control target key start
LH: loop header
LB: loop body
LE: loop exit
PB: predicated region body
PF: predicated region fallthrough
CT: control target
= control target key end

     0   :  { %s4292_s0 = inlined_call_operand.vmem [shape: f32[256,152], index: 0, kind: input, shape index: {}]   ;;  %s4293_s1 = inlined_call_operand.vmem [shape: f32[256,64], index: 1, kind: input, shape index: {}]   ;;  %s4294_s2 = inlined_call_operand.vmem [shape: bf16[128,128], index: 2, kind: input, shape index: {}]   ;;  %s4295_s3 = inlined_call_operand.vmem [shape: bf16[1,128], index: 3, kind: input, shape index: {}]   ;;  %s4296_s4 = inlined_call_operand.vmem [shape: bf16[128,128], index: 4, kind: input, shape index: {}]   ;;  %s4297_s5 = inlined_call_operand.vmem [shape: bf16[1,128], index: 5, kind: input, shape index: {}]   ;;  %s4298_s6 = inlined_call_operand.vmem [shape: bf16[128,128], index: 6, kind: input, shape index: {}]   ;;  %s4299_s7 = inlined_call_operand.vmem [shape: bf16[1,128], index: 7, kind: input, shape index: {}]   ;;  %s4300_s8 = inlined_call_operand.vmem [shape: bf16[128,64], index: 8, kind: input, shape index: {}]   ;;  %s4301_s9 = inlined_call_operand.vmem [shape: bf16[1,64], index: 9, kind: input, shape index: {}]   ;;  %s4302_s10 = inlined_call_operand.vmem [shape: bf16[64,128], index: 10, kind: input, shape index: {}]   ;;  %s4303_s11 = inlined_call_operand.vmem [shape: bf16[1,128], index: 11, kind: input, shape index: {}]   ;;  %s4304_s12 = inlined_call_operand.vmem [shape: bf16[128,128], index: 12, kind: input, shape index: {}]   ;;  %s4305_s13 = inlined_call_operand.vmem [shape: bf16[1,128], index: 13, kind: input, shape index: {}]   ;;  %s4306_s14 = inlined_call_operand.vmem [shape: bf16[128,128], index: 14, kind: input, shape index: {}]   ;;  %s4307_s15 = inlined_call_operand.vmem [shape: bf16[1,128], index: 15, kind: input, shape index: {}]   ;;  %s4308_s16 = inlined_call_operand.vmem [shape: bf16[128,64], index: 16, kind: input, shape index: {}]   ;;  %s4309_s17 = inlined_call_operand.vmem [shape: bf16[1,64], index: 17, kind: input, shape index: {}]   ;;  %s4310_s18 = inlined_call_operand.hbm [shape: bf16[256,128], index: 18, kind: output, shape index: {}]  }
   0x1   :  { %4318 = sst [smem:[#allocation11_spill]] %s4292_s0 }
   0x2   :  { %4319 = sst [smem:[#allocation12_spill]] %s4293_s1 }
   0x3   :  { %4320 = sst [smem:[#allocation13_spill]] %s4294_s2 }
   0x4   :  { %4321 = sst [smem:[#allocation14_spill]] %s4295_s3 }
   0x5   :  { %23 = vsyncpa [#allocation4], 0 }
   0x6   :  { %25 = vsyncpa [#allocation4 + $0x1], 0  ;;  %s3606_s27 = smov 0   ;;  %s3608_s28 = smov 0  }
   0x7   :  { %s3610_s29 = smov 0   ;;  %s3612_s30 = smov 0  }
   0x8 LB: > { %4322 = sst [smem:[#allocation6_spill]] %s3496_s28  ;;  %s3627_s0 = sadd.s32 4294967295, %s3504_s30   ;;  %s3504_s30 = sphi %s3612_s30, %s4337_s30   ;;  %s3500_s29 = sphi %s3610_s29, %s4340_s29   ;;  %s3496_s28 = sphi %s3608_s28, %s4339_s28   ;;  %s3492_s27 = sphi %s3606_s27, %s4338_s27  }
   0x9   : > { %4323 = sst [smem:[#allocation7_spill]] %s3500_s29  ;;  %s2767_s19 = sadd.s32 4294967294, %s3504_s30  }
   0xa   : > { %4324 = sst [smem:[#allocation8_spill]] %s3504_s30  ;;  %s3631_s1 = sadd.s32 1, %s3504_s30  }
   0xb   : > { %4325 = sst [smem:[#allocation9_spill]] %s3631_s1  ;;  %s38_s20 = sadd.s32 1, %s3500_s29 }
   0xc   : > { %s35_s21 = ssub.s32 %s3504_s30, %s3631_s1  ;;  %p45_p0 = scmp.ne.s32.totalorder %s3500_s29, %s3496_s28 }
   0xd   : > { %p36_p1 = scmp.eq.s32.totalorder %s35_s21, 0  ;;  %p46_p2 = scmp.eq.s32.totalorder %s3504_s30, 0 }
   0xe   : > { %p437_p3 = scmp.eq.s32.totalorder %s3627_s0, 1  ;;  %p442_p4 = scmp.ne.s32.totalorder %s3496_s28, %s3492_s27 }
   0xf   : > { %s3643_s22 = scalar_select %p36_p1, %s3500_s29, %s38_s20  }
  0x10   : > { %p47_p5 = por %p46_p2, %p45_p0  ;;  %p3645_p6 = por %p437_p3, %p45_p0 }
  0x11   : > { %4326 = sst [smem:[#allocation10_spill]] %s3643_s22  ;;  %p443_p7 = scmp.eq.s32.totalorder %s2767_s19, 1 }
  0x12   : > { %p2769_p9 = scmp.ge.s32.totalorder %s3504_s30, 2 }
  0x13   : > { %p3649_p8 = por %p443_p7, %p442_p4 }
  0x14   : > { %507 = sbr.rel (%p2769_p9) target bundleno = 45 (0x2d), region = 80 }
  0x1b   : > { %510 = sbr.rel (!%p47_p5) target bundleno = 45 (0x2d), region = 84  ;;  %s512_s24 = sand.u32 (%p47_p5), 1, %s3500_s29  }
  0x1c   : > { %s2869_s25 = sshll.u32 (%p47_p5), %s3504_s30, 8  ;;  %s2770_s26 = sshll.u32 (%p47_p5), %s512_s24, 7 }
  0x1d   : > { %s4329_s22 = sld [smem:[#allocation11_spill]] (%p47_p5)  ;;  %s514_s19 = scalar_lea.vmem (%p47_p5), [#allocation2], %s2770_s26 }
  0x23   : > { %s3661_s1 = scalar_lea.vmem %s4329_s22, %s2869_s25 }
  0x24   : > { %v576_v0 = vld [vmem:[%s3661_s1] sm:$0xff]  ;;  %v578_v1 = vld [vmem:[%s3661_s1 + $0x10] sm:$0xff] }
  0x25   : > { %v580_v2 = vld [vmem:[%s3661_s1 + $0x20] sm:$0xff]  ;;  %577 = vst [vmem:[%s514_s19] sm:$0xff] %v576_v0  ;;  %579 = vst [vmem:[%s514_s19 + $0x8] sm:$0xff] %v578_v1  ;;  %v582_v3 = vld [vmem:[%s3661_s1 + $0x30] sm:$0xff] }
  0x26   : > { %581 = vst [vmem:[%s514_s19 + $0x10] sm:$0xff] %v580_v2  ;;  %v584_v4 = vld [vmem:[%s3661_s1 + $0x40] sm:$0xff]  ;;  %v586_v5 = vld [vmem:[%s3661_s1 + $0x50] sm:$0xff]  ;;  %583 = vst [vmem:[%s514_s19 + $0x18] sm:$0xff] %v582_v3 }
  0x27   : > { %585 = vst [vmem:[%s514_s19 + $0x20] sm:$0xff] %v584_v4  ;;  %587 = vst [vmem:[%s514_s19 + $0x28] sm:$0xff] %v586_v5  ;;  %v588_v6 = vld [vmem:[%s3661_s1 + $0x60] sm:$0xff]  ;;  %v590_v7 = vld [vmem:[%s3661_s1 + $0x70] sm:$0xff] }
  0x28   : > { %v592_v8 = vld [vmem:[%s3661_s1 + $0x80] sm:$0xff]  ;;  %589 = vst [vmem:[%s514_s19 + $0x30] sm:$0xff] %v588_v6  ;;  %591 = vst [vmem:[%s514_s19 + $0x38] sm:$0xff] %v590_v7  ;;  %v594_v9 = vld [vmem:[%s3661_s1 + $0x90] sm:$0xff] }
  0x29   : > { %593 = vst [vmem:[%s514_s19 + $0x40] sm:$0xff] %v592_v8  ;;  %v596_v10 = vld [vmem:[%s3661_s1 + $0xa0] sm:$0xff]  ;;  %v598_v11 = vld [vmem:[%s3661_s1 + $0xb0] sm:$0xff]  ;;  %595 = vst [vmem:[%s514_s19 + $0x48] sm:$0xff] %v594_v9 }
  0x2a   : > { %597 = vst [vmem:[%s514_s19 + $0x50] sm:$0xff] %v596_v10  ;;  %599 = vst [vmem:[%s514_s19 + $0x58] sm:$0xff] %v598_v11  ;;  %v600_v12 = vld [vmem:[%s3661_s1 + $0xc0] sm:$0xff]  ;;  %v602_v13 = vld [vmem:[%s3661_s1 + $0xd0] sm:$0xff] }
  0x2b   : > { %v604_v14 = vld [vmem:[%s3661_s1 + $0xe0] sm:$0xff]  ;;  %601 = vst [vmem:[%s514_s19 + $0x60] sm:$0xff] %v600_v12  ;;  %603 = vst [vmem:[%s514_s19 + $0x68] sm:$0xff] %v602_v13  ;;  %v606_v15 = vld [vmem:[%s3661_s1 + $0xf0] sm:$0xff] }
  0x2c   : > { %605 = vst [vmem:[%s514_s19 + $0x70] sm:$0xff] %v604_v14  ;;  %607 = vst [vmem:[%s514_s19 + $0x78] sm:$0xff] %v606_v15 }
  0x2d PF: > { %p2774_p10 = scmp.ge.s32.totalorder %s3504_s30, 1  ;;  %p621_p11 = scmp.lt.s32.totalorder %s3504_s30, 3 }
  0x2f   : > { %p622_p12 = pnand %p2774_p10, %p621_p11 }
  0x30   : > { %s4330_s25 = sld [smem:[#allocation13_spill]] (!%p622_p12)  ;;  %s3685_s26 = sand.u32 (!%p622_p12), 1, %s3496_s28   ;;  %v3294_v25 = vld [vmem:[%s4296_s4] sm:$0xff] (!%p622_p12)   ;;  %v3295_v49 = vld [vmem:[%s4296_s4 + $0x8] sm:$0xff] (!%p622_p12)   ;;  %v3296_v50 = vld [vmem:[%s4296_s4 + $0x10] sm:$0xff] (!%p622_p12)   ;;  %v893_v58 = vlaneseq (!%p622_p12)  ;;  %v3506_v8 = vmov (!%p622_p12), 0  }
  0x31   : > { %625 = sbr.rel (%p622_p12) target bundleno = 1691 (0x69b), region = 126  ;;  %s2775_s1 = sshll.u32 (!%p622_p12), %s3685_s26, 7  ;;  %3027 = vmatprep.subr.bf16.mxu1 (!%p622_p12), %v3294_v25  ;;  %v3297_v51 = vld [vmem:[%s4296_s4 + $0x18] sm:$0xff] (!%p622_p12)   ;;  %v3298_v52 = vld [vmem:[%s4296_s4 + $0x20] sm:$0xff] (!%p622_p12)   ;;  %v3299_v53 = vld [vmem:[%s4296_s4 + $0x28] sm:$0xff] (!%p622_p12)  }
  0x32   : > { %s3697_s28 = scalar_lea.vmem (!%p622_p12), [#allocation2], %s2775_s1  ;;  %3028 = vmatpush3.bf16.msra.mxu1 (!%p622_p12), %v3294_v25  ;;  %v3300_v54 = vld [vmem:[%s4296_s4 + $0x30] sm:$0xff] (!%p622_p12)   ;;  %v3301_v55 = vld [vmem:[%s4296_s4 + $0x38] sm:$0xff] (!%p622_p12)   ;;  %v3302_v56 = vld [vmem:[%s4298_s6] sm:$0xff] (!%p622_p12)   ;;  %v894_v59 = vshrl.u32 (!%p622_p12), %v893_v58, 7  ;;  %s4331_s3 = sld [smem:[#allocation14_spill]] (!%p622_p12) }
  0x33   : > { %v696_v20 = vld [vmem:[%s3697_s28] sm:$0xff] (!%p622_p12)  ;;  %v697_v21 = vld [vmem:[%s3697_s28 + $0x8] sm:$0xff] (!%p622_p12)  ;;  %v698_v28 = vld [vmem:[%s3697_s28 + $0x10] sm:$0xff] (!%p622_p12)  ;;  %3029 = vmatprep.subr.bf16.mxu1 (!%p622_p12), %v3295_v49  ;;  %s4333_s29 = sld [smem:[#allocation12_spill]] (!%p622_p12)  ;;  %s2776_s30 = sshll.u32 (!%p622_p12), %s3685_s26, 6 }
  0x34   : > { %v728_v22 = vpack.c.bf16 (!%p622_p12), %v697_v21, %v696_v20  ;;  %v699_v29 = vld [vmem:[%s3697_s28 + $0x18] sm:$0xff] (!%p622_p12)  ;;  %v700_v30 = vld [vmem:[%s3697_s28 + $0x20] sm:$0xff] (!%p622_p12)  ;;  %v701_v31 = vld [vmem:[%s3697_s28 + $0x28] sm:$0xff] (!%p622_p12)  ;;  %v3760_v62 = vsub.s32 (!%p622_p12), 0, %v894_v59  ;;  %s4196_s21 = scalar_lea.vmem (!%p622_p12), [#allocation3], %s2776_s30  ;;  %s2870_s19 = sshll.u32 (!%p622_p12), %s3627_s0, 10 }
  0x35   : > { %v729_v32 = vpack.c.bf16 (!%p622_p12), %v699_v29, %v698_v28  ;;  %v730_v33 = vpack.c.bf16 (!%p622_p12), %v701_v31, %v700_v30  ;;  %v702_v34 = vld [vmem:[%s3697_s28 + $0x30] sm:$0xff] (!%p622_p12)  ;;  %v703_v35 = vld [vmem:[%s3697_s28 + $0x38] sm:$0xff] (!%p622_p12)  ;;  %v704_v36 = vld [vmem:[%s3697_s28 + $0x40] sm:$0xff] (!%p622_p12)  ;;  %s3509_s30 = smov (!%p622_p12), [#allocation3]  }
  0x36   : > { %v3286_v16 = vld [vmem:[%s4330_s25] sm:$0xff] (!%p622_p12)   ;;  %v3287_v17 = vld [vmem:[%s4330_s25 + $0x8] sm:$0xff] (!%p622_p12)   ;;  %v3288_v18 = vld [vmem:[%s4330_s25 + $0x10] sm:$0xff] (!%p622_p12)   ;;  %3011 = vmatprep.mubr.bf16.mxu0 (!%p622_p12), %v728_v22  ;;  %v731_v38 = vpack.c.bf16 (!%p622_p12), %v703_v35, %v702_v34  ;;  %3030 = vmatpush3.bf16.msra.mxu1 (!%p622_p12), %v3295_v49 }
  0x37   : > { %2995 = vmatprep.subr.bf16.mxu0 (!%p622_p12), %v3286_v16  ;;  %v3289_v19 = vld [vmem:[%s4330_s25 + $0x18] sm:$0xff] (!%p622_p12)   ;;  %v3290_v23 = vld [vmem:[%s4330_s25 + $0x20] sm:$0xff] (!%p622_p12)   ;;  %v3291_v24 = vld [vmem:[%s4330_s25 + $0x28] sm:$0xff] (!%p622_p12)   ;;  %3031 = vmatprep.subr.bf16.mxu1 (!%p622_p12), %v3296_v50 }
  0x38   : > { %2996 = vmatpush3.bf16.msra.mxu0 %v3286_v16  ;;  %v3292_v26 = vld [vmem:[%s4330_s25 + $0x30] sm:$0xff]   ;;  %v3293_v27 = vld [vmem:[%s4330_s25 + $0x38] sm:$0xff]   ;;  %v705_v37 = vld [vmem:[%s3697_s28 + $0x48] sm:$0xff] }
  0x39   : > { %2997 = vmatprep.subr.bf16.mxu0 %v3287_v17  ;;  %v732_v39 = vpack.c.bf16 %v705_v37, %v704_v36  ;;  %v706_v40 = vld [vmem:[%s3697_s28 + $0x50] sm:$0xff]  ;;  %v707_v41 = vld [vmem:[%s3697_s28 + $0x58] sm:$0xff]  ;;  %v708_v42 = vld [vmem:[%s3697_s28 + $0x60] sm:$0xff]  ;;  %v3507_v36 = vmov 1065369472  }
  0x3a   : > { %v709_v43 = vld [vmem:[%s3697_s28 + $0x68] sm:$0xff]  ;;  %v733_v44 = vpack.c.bf16 %v707_v41, %v706_v40  ;;  %v710_v46 = vld [vmem:[%s3697_s28 + $0x70] sm:$0xff]  ;;  %v711_v47 = vld [vmem:[%s3697_s28 + $0x78] sm:$0xff]  ;;  %3032 = vmatpush3.bf16.msra.mxu1 %v3296_v50  ;;  %s2777_s28 = sshll.u32 %s3627_s0, 4  ;;  %s4240_s0 = scalar_lea.hbm %s4310_s18, %s2870_s19 }
  0x3b   : > { %v734_v45 = vpack.c.bf16 %v709_v43, %v708_v42  ;;  %v735_v48 = vpack.c.bf16 %v711_v47, %v710_v46  ;;  %3033 = vmatprep.subr.bf16.mxu1 %v3297_v51  ;;  %v3303_v57 = vld [vmem:[%s4298_s6 + $0x8] sm:$0xff]   ;;  %v889_v60 = vld [vmem:[%s4331_s3] sm:$0x1]  ;;  %p3839_p13 = scmp.lt.s32.totalorder %s2777_s28, 31  ;;  %s3446_s19 = sshll.u32 %s3509_s30, 4  ;;  %s3447_s19 = int_to_ptr.vmem [resolvable:$false] %s3446_s19 }
  0x3c   : > { %2998 = vmatpush3.bf16.msra.mxu0 %v3287_v17  ;;  %v891_v61 = vpack.i.b16 %v889_v60, %v889_v60  ;;  %s3448_s22 = scalar_lea.vmem %s3447_s19, 2048 }
  0x3d   : > { %2999 = vmatprep.subr.bf16.mxu0 %v3288_v18  ;;  %s4342_s28 = smov (!%p3839_p13, %s2777_s28), 31 }
  0x3e   : > { %3034 = vmatpush3.bf16.msra.mxu1 %v3297_v51  ;;  %v896_v1 = vrot.slane %v891_v61, %v3760_v62  ;;  %s2778_s1 = sshll.u32 %s4342_s28, 3 }
  0x3f   : > { %3035 = vmatprep.subr.bf16.mxu1 %v3298_v52  ;;  %s3857_s20 = scalar_lea.vmem %s4333_s29, %s2778_s1  ;;  %s4317_s29 = smov 64  }
  0x40   : > { %3000 = vmatpush3.bf16.msra.mxu0 %v3288_v18  ;;  %s2687_s1 = sshll.u32 %s4196_s21, 4  ;;  %s4242_s1 = int_to_ptr.vmem [resolvable:$true] %s2687_s1 }
  0x41   : > { %3001 = vmatprep.subr.bf16.mxu0 %v3289_v19  ;;  %s3442_s28 = scalar_lea.vmem %s4242_s1, 1024  ;;  %p3449_p3 = scmp.lt.s32.totalorder %s4242_s1, %s3447_s19 }
  0x42   : > { %3036 = vmatpush3.bf16.msra.mxu1 %v3298_v52  ;;  %p3443_p0 = scmp.ne.s32.totalorder %s4242_s1, %s3442_s28  ;;  %p3450_p4 = scmp.lt.s32.totalorder %s3448_s22, %s3442_s28 }
  0x43   : > { %3037 = vmatprep.subr.bf16.mxu1 %v3299_v53 }
  0x44   : > { %3002 = vmatpush3.bf16.msra.mxu0 %v3289_v19  ;;  %p3444_p1 = pnand %p3443_p0, %p3645_p6  ;;  %p3451_p5 = por %p3450_p4, %p3449_p3 }
  0x45   : > { %3003 = vmatprep.subr.bf16.mxu0 %v3290_v23 }
  0x46   : > { %3038 = vmatpush3.bf16.msra.mxu1 %v3299_v53  ;;  %p3445_p2 = pneg %p3444_p1 }
  0x47   : > { %3039 = vmatprep.subr.bf16.mxu1 %v3300_v54 }
  0x48   : > { %3004 = vmatpush3.bf16.msra.mxu0 %v3290_v23  ;;  %p3452_p7 = pnand %p3451_p5, %p3445_p2 }
  0x49   : > { %3005 = vmatprep.subr.bf16.mxu0 %v3291_v24 }
  0x4a   : > { %3040 = vmatpush3.bf16.msra.mxu1 %v3300_v54 }
  0x4b   : > { %3041 = vmatprep.subr.bf16.mxu1 %v3301_v55 }
  0x4c   : > { %3006 = vmatpush3.bf16.msra.mxu0 %v3291_v24 }
  0x4d   : > { %3007 = vmatprep.subr.bf16.mxu0 %v3292_v26 }
  0x4e   : > { %3042 = vmatpush3.bf16.msra.mxu1 %v3301_v55 }
  0x50   : > { %3008 = vmatpush3.bf16.msra.mxu0 %v3292_v26 }
  0x51   : > { %3009 = vmatprep.subr.bf16.mxu0 %v3293_v27 }
  0x54   : > { %3010 = vmatpush3.bf16.msra.mxu0 %v3293_v27 }
  0x55   : > { %3059 = vmatprep.subr.bf16.mxu0 %v3302_v56 }
  0x57   : > { %3012 = vmatmul.mubr.bf16.vlgmr.msra.gmra.mrb[0].mxu0 %v729_v32 }
  0x58   : > { %3015 = vmatprep.mubr.bf16.mxu0 %v730_v33  ;;  %3060 = vmatpush3.bf16.msra.mxu0 %v3302_v56 }
  0x59   : > { %3061 = vmatprep.subr.bf16.mxu0 %v3303_v57 }
  0x5c   : > { %3062 = vmatpush3.bf16.msra.mxu0 %v3303_v57 }
  0x5f   : > { %3016 = vmatmul.mubr.bf16.gmra.mrb[4].mxu0 %v731_v38 }
  0x60   : > { %3019 = vmatprep.mubr.bf16.mxu0 %v732_v39 }
  0x67   : > { %3020 = vmatmul.mubr.bf16.gmra.mrb[8].mxu0 %v733_v44 }
  0x68   : > { %3023 = vmatprep.mubr.bf16.mxu0 %v734_v45 }
  0x6f   : > { %3024 = vmatmul.mubr.bf16.gmra.mrb[12].mxu0 %v735_v48 }
 0x12a   : > { %v3013_v63 = vpop.f32.mrb[0].mxu0 }
 0x12b   : > { %v818_v0 = vpop.f32.mrb[1].mxu0 }
 0x12c   : > { %v3014_v2 = vpop.f32.mrb[2].mxu0 }
 0x12d   : > { %v882_v3 = vpack.c.bf16 %v3014_v2, %v3013_v63  ;;  %v821_v4 = vpop.f32.mrb[3].mxu0 }
 0x12e   : > { %v881_v5 = vpack.c.bf16 %v821_v4, %v818_v0 }
 0x12f   : > { %v898_v6 = vadd.bf16 %v896_v1, %v882_v3 }
 0x130   : > { %v897_v7 = vadd.bf16 %v896_v1, %v881_v5 }
 0x131   : > { %v914_v9 = vmin.bf16 %v3506_v8, %v898_v6  ;;  %vm906_vm1 = vcmp.gt.bf16.partialorder %v898_v6, 0 }
 0x132   : > { %v913_v10 = vmin.bf16 %v3506_v8, %v897_v7  ;;  %v3017_v11 = vpop.f32.mrb[4].mxu0  ;;  %vm905_vm0 = vcmp.gt.bf16.partialorder %v897_v7, 0 }
 0x133   : > { %v925_v12 = vmul.bf16 1069105081, %v914_v9  ;;  %v834_v13 = vpop.f32.mrb[5].mxu0 }
 0x134   : > { %v922_v14 = vmul.bf16 1069105081, %v913_v10  ;;  %v3018_v15 = vpop.f32.mrb[6].mxu0 }
 0x135   : > { %3346 = vpow.bf16 %v925_v12  ;;  %v884_v16 = vpack.c.bf16 %v3018_v15, %v3017_v11  ;;  %v837_v17 = vpop.f32.mrb[7].mxu0  ;;  %v3304_v12 = vld [vmem:[%s4298_s6 + $0x10] sm:$0xff]   ;;  %v3307_v15 = vld [vmem:[%s4298_s6 + $0x28] sm:$0xff]  }
 0x136   : > { %3348 = vpow.bf16 %v922_v14  ;;  %v883_v18 = vpack.c.bf16 %v837_v17, %v834_v13  ;;  %3063 = vmatprep.subr.bf16.mxu0 %v3304_v12  ;;  %v3305_v13 = vld [vmem:[%s4298_s6 + $0x18] sm:$0xff]   ;;  %v3306_v14 = vld [vmem:[%s4298_s6 + $0x20] sm:$0xff]  }
 0x137   : > { %v900_v19 = vadd.bf16 %v896_v1, %v884_v16  ;;  %3064 = vmatpush3.bf16.msra.mxu0 %v3304_v12  ;;  %v3308_v16 = vld [vmem:[%s4298_s6 + $0x30] sm:$0xff]   ;;  %v3309_v17 = vld [vmem:[%s4298_s6 + $0x38] sm:$0xff]  }
 0x138   : > { %v899_v20 = vadd.bf16 %v896_v1, %v883_v18  ;;  %3065 = vmatprep.subr.bf16.mxu0 %v3305_v13  ;;  %v3800_v18 = vld [vmem:[%s4302_s10] sm:$0xff]  }
 0x139   : > { %v916_v21 = vmin.bf16 %v3506_v8, %v900_v19  ;;  %vm908_vm3 = vcmp.gt.bf16.partialorder %v900_v19, 0 }
 0x13a   : > { %v915_v22 = vmin.bf16 %v3506_v8, %v899_v20  ;;  %v3021_v23 = vpop.f32.mrb[8].mxu0  ;;  %vm907_vm2 = vcmp.gt.bf16.partialorder %v899_v20, 0 }
 0x13b   : > { %v931_v24 = vmul.bf16 1069105081, %v916_v21  ;;  %v850_v25 = vpop.f32.mrb[9].mxu0  ;;  %3066 = vmatpush3.bf16.msra.mxu0 %v3305_v13  ;;  %v1130_v21 = vld [vmem:[%s4297_s5] sm:$0x1] }
 0x13c   : > { %v928_v26 = vmul.bf16 1069105081, %v915_v22  ;;  %v3022_v27 = vpop.f32.mrb[10].mxu0  ;;  %3067 = vmatprep.subr.bf16.mxu0 %v3306_v14  ;;  %v1132_v22 = vpack.i.b16 %v1130_v21, %v1130_v21 }
 0x13d   : > { %3350 = vpow.bf16 %v931_v24  ;;  %v886_v28 = vpack.c.bf16 %v3022_v27, %v3021_v23  ;;  %v853_v29 = vpop.f32.mrb[11].mxu0 }
 0x13e   : > { %3352 = vpow.bf16 %v928_v26  ;;  %v885_v30 = vpack.c.bf16 %v853_v29, %v850_v25  ;;  %v1137_v25 = vrot.slane %v1132_v22, %v3760_v62 }
 0x13f   : > { %v902_v31 = vadd.bf16 %v896_v1, %v886_v28  ;;  %3068 = vmatpush3.bf16.msra.mxu0 %v3306_v14 }
 0x140   : > { %v3347_v32 = vpop.eup %3346  ;;  %v901_v33 = vadd.bf16 %v896_v1, %v885_v30  ;;  %3069 = vmatprep.subr.bf16.mxu0 %v3307_v15 }
 0x141   : > { %v3349_v34 = vpop.eup %3348  ;;  %v918_v35 = vmin.bf16 %v3506_v8, %v902_v31  ;;  %v946_v37 = vsub.bf16 %v3347_v32, %v3507_v36  ;;  %vm910_vm5 = vcmp.gt.bf16.partialorder %v902_v31, 0 }
 0x142   : > { %v917_v38 = vmin.bf16 %v3506_v8, %v901_v33  ;;  %v3025_v39 = vpop.f32.mrb[12].mxu0  ;;  %v945_v40 = vsub.bf16 %v3349_v34, %v3507_v36  ;;  %vm909_vm4 = vcmp.gt.bf16.partialorder %v901_v33, 0 }
 0x143   : > { %v937_v41 = vmul.bf16 1069105081, %v918_v35  ;;  %v866_v42 = vpop.f32.mrb[13].mxu0  ;;  %v954_v48 = vsel %vm906_vm1, %v898_v6, %v946_v37  ;;  %3070 = vmatpush3.bf16.msra.mxu0 %v3307_v15  ;;  %v3312_v15 = vld [vmem:[%s4302_s10 + $0x10] sm:$0xff]  }
 0x144   : > { %v934_v43 = vmul.bf16 1069105081, %v917_v38  ;;  %v3026_v44 = vpop.f32.mrb[14].mxu0  ;;  %v953_v45 = vsel %vm905_vm0, %v897_v7, %v945_v40  ;;  %3071 = vmatprep.subr.bf16.mxu0 %v3308_v16  ;;  %vm1684_vm0 = vcmask 523264  }
 0x145   : > { %3354 = vpow.bf16 %v937_v41  ;;  %v888_v46 = vpack.c.bf16 %v3026_v44, %v3025_v39  ;;  %v869_v47 = vpop.f32.mrb[15].mxu0  ;;  %3043 = vmatprep.mubr.bf16.mxu1 %v953_v45 }
 0x146   : > { %3356 = vpow.bf16 %v934_v43  ;;  %v887_v49 = vpack.c.bf16 %v869_v47, %v866_v42  ;;  %3044 = vmatmul.mubr.bf16.vlgmr.msra.gmra.mrb[0].mxu1 %v954_v48 }
 0x147   : > { %v904_v50 = vadd.bf16 %v896_v1, %v888_v46  ;;  %3072 = vmatpush3.bf16.msra.mxu0 %v3308_v16 }
 0x148   : > { %v3351_v51 = vpop.eup %3350  ;;  %v903_v52 = vadd.bf16 %v896_v1, %v887_v49  ;;  %3073 = vmatprep.subr.bf16.mxu0 %v3309_v17 }
 0x149   : > { %v3353_v53 = vpop.eup %3352  ;;  %v920_v54 = vmin.bf16 %v3506_v8, %v904_v50  ;;  %v948_v55 = vsub.bf16 %v3351_v51, %v3507_v36  ;;  %vm912_vm7 = vcmp.gt.bf16.partialorder %v904_v50, 0 }
 0x14a   : > { %v919_v56 = vmin.bf16 %v3506_v8, %v903_v52  ;;  %v947_v57 = vsub.bf16 %v3353_v53, %v3507_v36  ;;  %vm911_vm6 = vcmp.gt.bf16.partialorder %v903_v52, 0 }
 0x14b   : > { %v943_v58 = vmul.bf16 1069105081, %v920_v54  ;;  %v956_v61 = vsel %vm908_vm3, %v900_v19, %v948_v55  ;;  %3074 = vmatpush3.bf16.msra.mxu0 %v3309_v17  ;;  %v3314_v19 = vld [vmem:[%s4300_s8] sm:$0xff]  }
 0x14c   : > { %v940_v59 = vmul.bf16 1069105081, %v919_v56  ;;  %v955_v60 = vsel %vm907_vm2, %v899_v20, %v947_v57  ;;  %3123 = vmatprep.subr.bf16.mxu0 %v3800_v18  ;;  %v3315_v20 = vld [vmem:[%s4300_s8 + $0x8] sm:$0xff]   ;;  %3091 = vmatprep.subr.bf16.mxu1 %v3314_v19 }
 0x14d   : > { %3358 = vpow.bf16 %v943_v58  ;;  %3047 = vmatprep.mubr.bf16.mxu1 %v955_v60  ;;  %3092 = vmatpush3.bf16.msra.mxu1 %v3314_v19 }
 0x14e   : > { %3360 = vpow.bf16 %v940_v59  ;;  %3048 = vmatmul.mubr.bf16.gmra.mrb[4].mxu1 %v956_v61  ;;  %3093 = vmatprep.subr.bf16.mxu1 %v3315_v20 }
 0x150   : > { %v3355_v63 = vpop.eup %3354 }
 0x151   : > { %v3357_v0 = vpop.eup %3356  ;;  %v950_v1 = vsub.bf16 %v3355_v63, %v3507_v36  ;;  %3094 = vmatpush3.bf16.msra.mxu1 %v3315_v20 }
 0x152   : > { %v949_v2 = vsub.bf16 %v3357_v0, %v3507_v36 }
 0x153   : > { %v958_v4 = vsel %vm910_vm5, %v902_v31, %v950_v1 }
 0x154   : > { %v957_v3 = vsel %vm909_vm4, %v901_v33, %v949_v2 }
 0x155   : > { %3051 = vmatprep.mubr.bf16.mxu1 %v957_v3 }
 0x156   : > { %3052 = vmatmul.mubr.bf16.gmra.mrb[8].mxu1 %v958_v4 }
 0x158   : > { %v3359_v5 = vpop.eup %3358 }
 0x159   : > { %v3361_v6 = vpop.eup %3360  ;;  %v952_v7 = vsub.bf16 %v3359_v5, %v3507_v36 }
 0x15a   : > { %v951_v9 = vsub.bf16 %v3361_v6, %v3507_v36  ;;  %v3311_v6 = vld [vmem:[%s4302_s10 + $0x8] sm:$0xff]  }
 0x15b   : > { %v960_v11 = vsel %vm912_vm7, %v904_v50, %v952_v7 }
 0x15c   : > { %v959_v10 = vsel %vm911_vm6, %v903_v52, %v951_v9 }
 0x15d   : > { %3055 = vmatprep.mubr.bf16.mxu1 %v959_v10 }
 0x15e   : > { %3056 = vmatmul.mubr.bf16.gmra.mrb[12].mxu1 %v960_v11 }
 0x219   : > { %v3045_v23 = vpop.f32.mrb[0].mxu1 }
 0x21a   : > { %v1059_v24 = vpop.f32.mrb[1].mxu1 }
 0x21b   : > { %v3046_v26 = vpop.f32.mrb[2].mxu1 }
 0x21c   : > { %v1123_v27 = vpack.c.bf16 %v3046_v26, %v3045_v23  ;;  %v1062_v28 = vpop.f32.mrb[3].mxu1 }
 0x21d   : > { %v1122_v29 = vpack.c.bf16 %v1062_v28, %v1059_v24  ;;  %v3313_v24 = vld [vmem:[%s4302_s10 + $0x18] sm:$0xff]  }
 0x21e   : > { %v1139_v30 = vadd.bf16 %v1137_v25, %v1123_v27 }
 0x21f   : > { %v1138_v31 = vadd.bf16 %v1137_v25, %v1122_v29 }
 0x220   : > { %v1155_v32 = vmin.bf16 %v3506_v8, %v1139_v30  ;;  %vm1147_vm9 = vcmp.gt.bf16.partialorder %v1139_v30, 0 }
 0x221   : > { %v1154_v33 = vmin.bf16 %v3506_v8, %v1138_v31  ;;  %v3049_v34 = vpop.f32.mrb[4].mxu1  ;;  %vm1146_vm8 = vcmp.gt.bf16.partialorder %v1138_v31, 0 }
 0x222   : > { %v1166_v35 = vmul.bf16 1069105081, %v1155_v32  ;;  %v1075_v37 = vpop.f32.mrb[5].mxu1 }
 0x223   : > { %v1163_v38 = vmul.bf16 1069105081, %v1154_v33  ;;  %v3050_v39 = vpop.f32.mrb[6].mxu1  ;;  %v1628_v33 = vld [vmem:[%s3857_s20] sm:$0xff] }
 0x224   : > { %3362 = vpow.bf16 %v1166_v35  ;;  %v1125_v40 = vpack.c.bf16 %v3050_v39, %v3049_v34  ;;  %v1078_v41 = vpop.f32.mrb[7].mxu1  ;;  %v1629_v34 = vld [vmem:[%s3857_s20 + $0x8] sm:$0xff] }
 0x225   : > { %3364 = vpow.bf16 %v1163_v38  ;;  %v1124_v42 = vpack.c.bf16 %v1078_v41, %v1075_v37  ;;  %v1652_v39 = vpack.c.bf16 %v1629_v34, %v1628_v33 }
 0x226   : > { %v3815_v43 = vadd.bf16 %v1137_v25, %v1125_v40 }
 0x227   : > { %v1140_v44 = vadd.bf16 %v1137_v25, %v1124_v42  ;;  %v1630_v42 = vld [vmem:[%s3857_s20 + $0x10] sm:$0xff] }
 0x228   : > { %v1157_v45 = vmin.bf16 %v3506_v8, %v3815_v43  ;;  %vm1149_vm11 = vcmp.gt.bf16.partialorder %v3815_v43, 0 }
 0x229   : > { %v1156_v46 = vmin.bf16 %v3506_v8, %v1140_v44  ;;  %v3053_v47 = vpop.f32.mrb[8].mxu1  ;;  %vm1148_vm10 = vcmp.gt.bf16.partialorder %v1140_v44, 0 }
 0x22a   : > { %v1172_v48 = vmul.bf16 1069105081, %v1157_v45  ;;  %v1091_v49 = vpop.f32.mrb[9].mxu1  ;;  %v1633_v45 = vld [vmem:[%s3857_s20 + $0x28] sm:$0xff] }
 0x22b   : > { %v1169_v50 = vmul.bf16 1069105081, %v1156_v46  ;;  %v3054_v51 = vpop.f32.mrb[10].mxu1 }
 0x22c   : > { %3366 = vpow.bf16 %v1172_v48  ;;  %v1127_v52 = vpack.c.bf16 %v3054_v51, %v3053_v47  ;;  %v1094_v53 = vpop.f32.mrb[11].mxu1  ;;  %v1634_v48 = vld [vmem:[%s3857_s20 + $0x30] sm:$0xff]  ;;  %v1637_v51 = vld [vmem:[%s3857_s20 + $0x48] sm:$0xff] }
 0x22d   : > { %3368 = vpow.bf16 %v1169_v50  ;;  %v1126_v54 = vpack.c.bf16 %v1094_v53, %v1091_v49  ;;  %v1635_v49 = vld [vmem:[%s3857_s20 + $0x38] sm:$0xff]  ;;  %v1636_v50 = vld [vmem:[%s3857_s20 + $0x40] sm:$0xff] }
 0x22e   : > { %v3820_v55 = vadd.bf16 %v1137_v25, %v1127_v52  ;;  %v1655_v52 = vpack.c.bf16 %v1635_v49, %v1634_v48  ;;  %v1656_v53 = vpack.c.bf16 %v1637_v51, %v1636_v50 }
 0x22f   : > { %v3363_v56 = vpop.eup %3362  ;;  %v1142_v57 = vadd.bf16 %v1137_v25, %v1126_v54  ;;  %v1638_v54 = vld [vmem:[%s3857_s20 + $0x50] sm:$0xff] }
 0x230   : > { %v3365_v58 = vpop.eup %3364  ;;  %v1159_v59 = vmin.bf16 %v3506_v8, %v3820_v55  ;;  %v1187_v60 = vsub.bf16 %v3363_v56, %v3507_v36  ;;  %vm1151_vm13 = vcmp.gt.bf16.partialorder %v3820_v55, 0  ;;  %v1640_v56 = vld [vmem:[%s3857_s20 + $0x60] sm:$0xff] }
 0x231   : > { %v1158_v61 = vmin.bf16 %v3506_v8, %v1142_v57  ;;  %v3057_v63 = vpop.f32.mrb[12].mxu1  ;;  %v1186_v0 = vsub.bf16 %v3365_v58, %v3507_v36  ;;  %vm1150_vm12 = vcmp.gt.bf16.partialorder %v1142_v57, 0 }
 0x232   : > { %v1178_v1 = vmul.bf16 1069105081, %v1159_v59  ;;  %v1107_v2 = vpop.f32.mrb[13].mxu1  ;;  %v1195_v10 = vsel %vm1147_vm9, %v1139_v30, %v1187_v60  ;;  %v1642_v60 = vld [vmem:[%s3857_s20 + $0x70] sm:$0xff] }
 0x233   : > { %v1175_v3 = vmul.bf16 1069105081, %v1158_v61  ;;  %v3058_v4 = vpop.f32.mrb[14].mxu1  ;;  %v1194_v5 = vsel %vm1146_vm8, %v1138_v31, %v1186_v0  ;;  %v1643_v61 = vld [vmem:[%s3857_s20 + $0x78] sm:$0xff]  ;;  %v3316_v0 = vld [vmem:[%s4300_s8 + $0x10] sm:$0xff]  }
 0x234   : > { %3370 = vpow.bf16 %v1178_v1  ;;  %v1129_v7 = vpack.c.bf16 %v3058_v4, %v3057_v63  ;;  %v1110_v9 = vpop.f32.mrb[15].mxu1  ;;  %3075 = vmatprep.mubr.bf16.mxu0 %v1194_v5  ;;  %v1659_v63 = vpack.c.bf16 %v1643_v61, %v1642_v60  ;;  %3095 = vmatprep.subr.bf16.mxu1 %v3316_v0  ;;  %v3317_v1 = vld [vmem:[%s4300_s8 + $0x18] sm:$0xff]   ;;  %v3320_v4 = vld [vmem:[%s4300_s8 + $0x30] sm:$0xff]  }
 0x235   : > { %3372 = vpow.bf16 %v1175_v3  ;;  %v1128_v11 = vpack.c.bf16 %v1110_v9, %v1107_v2  ;;  %3076 = vmatmul.mubr.bf16.vlgmr.msra.gmra.mrb[16].mxu0 %v1195_v10  ;;  %3096 = vmatpush3.bf16.msra.mxu1 %v3316_v0  ;;  %v3318_v2 = vld [vmem:[%s4300_s8 + $0x20] sm:$0xff]   ;;  %v3319_v3 = vld [vmem:[%s4300_s8 + $0x28] sm:$0xff]   ;;  %v3321_v5 = vld [vmem:[%s4300_s8 + $0x38] sm:$0xff]  }
 0x236   : > { %v1145_v12 = vadd.bf16 %v1137_v25, %v1129_v7  ;;  %3124 = vmatpush3.bf16.msra.mxu0 %v3800_v18  ;;  %3097 = vmatprep.subr.bf16.mxu1 %v3317_v1  ;;  %v1371_v7 = vld [vmem:[%s4299_s7] sm:$0x1] }
 0x237   : > { %v3367_v13 = vpop.eup %3366  ;;  %v1144_v14 = vadd.bf16 %v1137_v25, %v1128_v11  ;;  %3125 = vmatprep.subr.bf16.mxu0 %v3311_v6  ;;  %v1373_v9 = vpack.i.b16 %v1371_v7, %v1371_v7 }
 0x238   : > { %v3369_v16 = vpop.eup %3368  ;;  %v1161_v17 = vmin.bf16 %v3506_v8, %v1145_v12  ;;  %v1189_v19 = vsub.bf16 %v3367_v13, %v3507_v36  ;;  %vm1153_vm15 = vcmp.gt.bf16.partialorder %v1145_v12, 0 }
 0x239   : > { %v1160_v20 = vmin.bf16 %v3506_v8, %v1144_v14  ;;  %v1188_v21 = vsub.bf16 %v3369_v16, %v3507_v36  ;;  %vm1152_vm14 = vcmp.gt.bf16.partialorder %v1144_v14, 0  ;;  %3098 = vmatpush3.bf16.msra.mxu1 %v3317_v1 }
 0x23a   : > { %v1184_v18 = vmul.bf16 1069105081, %v1161_v17  ;;  %3126 = vmatpush3.bf16.msra.mxu0 %v3311_v6  ;;  %v1197_v25 = vsel %vm1149_vm11, %v3815_v43, %v1189_v19  ;;  %v1631_v43 = vld [vmem:[%s3857_s20 + $0x18] sm:$0xff]  ;;  %3099 = vmatprep.subr.bf16.mxu1 %v3318_v2  ;;  %v3906_v6 = vld [vmem:[%s4304_s12] sm:$0xff]  }
 0x23b   : > { %v1181_v22 = vmul.bf16 1069105081, %v1160_v20  ;;  %v1196_v23 = vsel %vm1148_vm10, %v1140_v44, %v1188_v21  ;;  %3127 = vmatprep.subr.bf16.mxu0 %v3312_v15  ;;  %v1632_v44 = vld [vmem:[%s3857_s20 + $0x20] sm:$0xff]  ;;  %v1653_v46 = vpack.c.bf16 %v1631_v43, %v1630_v42 }
 0x23c   : > { %3374 = vpow.bf16 %v1184_v18  ;;  %3079 = vmatprep.mubr.bf16.mxu0 %v1196_v23  ;;  %v1654_v47 = vpack.c.bf16 %v1633_v45, %v1632_v44 }
 0x23d   : > { %3376 = vpow.bf16 %v1181_v22  ;;  %3080 = vmatmul.mubr.bf16.gmra.mrb[20].mxu0 %v1197_v25  ;;  %3100 = vmatpush3.bf16.msra.mxu1 %v3318_v2 }
 0x23e   : > { %3128 = vmatpush3.bf16.msra.mxu0 %v3312_v15  ;;  %3101 = vmatprep.subr.bf16.mxu1 %v3319_v3 }
 0x23f   : > { %v3371_v26 = vpop.eup %3370  ;;  %3129 = vmatprep.subr.bf16.mxu0 %v3313_v24 }
 0x240   : > { %v3373_v27 = vpop.eup %3372  ;;  %v1191_v28 = vsub.bf16 %v3371_v26, %v3507_v36 }
 0x241   : > { %v1190_v29 = vsub.bf16 %v3373_v27, %v3507_v36  ;;  %3102 = vmatpush3.bf16.msra.mxu1 %v3319_v3  ;;  %v3324_v3 = vld [vmem:[%s4304_s12 + $0x10] sm:$0xff]  }
 0x242   : > { %3130 = vmatpush3.bf16.msra.mxu0 %v3313_v24  ;;  %v1199_v31 = vsel %vm1151_vm13, %v3820_v55, %v1191_v28  ;;  %v1639_v55 = vld [vmem:[%s3857_s20 + $0x58] sm:$0xff]  ;;  %3103 = vmatprep.subr.bf16.mxu1 %v3320_v4 }
 0x243   : > { %v1198_v30 = vsel %vm1150_vm12, %v1142_v57, %v1190_v29  ;;  %v1641_v57 = vld [vmem:[%s3857_s20 + $0x68] sm:$0xff]  ;;  %v1657_v58 = vpack.c.bf16 %v1639_v55, %v1638_v54 }
 0x244   : > { %3083 = vmatprep.mubr.bf16.mxu0 %v1198_v30  ;;  %v1658_v59 = vpack.c.bf16 %v1641_v57, %v1640_v56  ;;  %v1814_v57 = vld [vmem:[%s4303_s11] sm:$0x1] }
 0x245   : > { %3084 = vmatmul.mubr.bf16.gmra.mrb[24].mxu0 %v1199_v31  ;;  %3104 = vmatpush3.bf16.msra.mxu1 %v3320_v4  ;;  %v1816_v0 = vpack.i.b16 %v1814_v57, %v1814_v57 }
 0x246   : > { %3105 = vmatprep.subr.bf16.mxu1 %v3321_v5 }
 0x247   : > { %v3375_v32 = vpop.eup %3374 }
 0x248   : > { %v3377_v35 = vpop.eup %3376  ;;  %v1193_v37 = vsub.bf16 %v3375_v32, %v3507_v36 }
 0x249   : > { %v1192_v38 = vsub.bf16 %v3377_v35, %v3507_v36  ;;  %3106 = vmatpush3.bf16.msra.mxu1 %v3321_v5 }
 0x24a   : > { %v1201_v41 = vsel %vm1153_vm15, %v1145_v12, %v1193_v37  ;;  %3147 = vmatprep.subr.bf16.mxu1 %v3906_v6  ;;  %v3913_v12 = vrot.slane %v1373_v9, %v3760_v62 }
 0x24b   : > { %v1200_v40 = vsel %vm1152_vm14, %v1144_v14, %v1192_v38 }
 0x24c   : > { %3087 = vmatprep.mubr.bf16.mxu0 %v1200_v40 }
 0x24d   : > { %3088 = vmatmul.mubr.bf16.gmra.mrb[28].mxu0 %v1201_v41 }
 0x24e   : > { %3131 = vmatprep.mubr.msk.bf16.mxu0 %vm1684_vm0, %v1652_v39 }
 0x255   : > { %3132 = vmatmul.mubr.msk.bf16.vlgmr.msra.gmra.mrb[32].mxu0 %vm1684_vm0, %v1653_v46 }
 0x256   : > { %3135 = vmatprep.mubr.msk.bf16.mxu0 %vm1684_vm0, %v1654_v47 }
 0x25d   : > { %3136 = vmatmul.mubr.msk.bf16.gmra.mrb[36].mxu0 %vm1684_vm0, %v1655_v52 }
 0x25e   : > { %3139 = vmatprep.mubr.msk.bf16.mxu0 %vm1684_vm0, %v1656_v53  ;;  %v3323_v53 = vld [vmem:[%s4304_s12 + $0x8] sm:$0xff]  }
 0x265   : > { %3140 = vmatmul.mubr.msk.bf16.gmra.mrb[40].mxu0 %vm1684_vm0, %v1657_v58 }
 0x266   : > { %3143 = vmatprep.mubr.msk.bf16.mxu0 %vm1684_vm0, %v1658_v59 }
 0x26d   : > { %3144 = vmatmul.mubr.msk.bf16.gmra.mrb[44].mxu0 %vm1684_vm0, %v1659_v63 }
 0x308   : > { %v3077_v10 = vpop.f32.mrb[16].mxu0 }
 0x309   : > { %v1300_v11 = vpop.f32.mrb[17].mxu0 }
 0x30a   : > { %v3078_v13 = vpop.f32.mrb[18].mxu0 }
 0x30b   : > { %v1364_v14 = vpack.c.bf16 %v3078_v13, %v3077_v10  ;;  %v1303_v15 = vpop.f32.mrb[19].mxu0  ;;  %v3961_v13 = vrot.slane %v1816_v0, %v3760_v62 }
 0x30c   : > { %v1363_v16 = vpack.c.bf16 %v1303_v15, %v1300_v11 }
 0x30d   : > { %v1380_v17 = vadd.bf16 %v3913_v12, %v1364_v14 }
 0x30e   : > { %v1379_v19 = vadd.bf16 %v3913_v12, %v1363_v16 }
 0x30f   : > { %v1396_v20 = vmin.bf16 %v3506_v8, %v1380_v17  ;;  %vm1388_vm2 = vcmp.gt.bf16.partialorder %v1380_v17, 0 }
 0x310   : > { %v1395_v21 = vmin.bf16 %v3506_v8, %v1379_v19  ;;  %v3081_v18 = vpop.f32.mrb[20].mxu0  ;;  %vm1387_vm1 = vcmp.gt.bf16.partialorder %v1379_v19, 0 }
 0x311   : > { %v1407_v22 = vmul.bf16 1069105081, %v1396_v20  ;;  %v1316_v23 = vpop.f32.mrb[21].mxu0 }
 0x312   : > { %v1404_v24 = vmul.bf16 1069105081, %v1395_v21  ;;  %v3082_v25 = vpop.f32.mrb[22].mxu0 }
 0x313   : > { %3378 = vpow.bf16 %v1407_v22  ;;  %v1366_v26 = vpack.c.bf16 %v3082_v25, %v3081_v18  ;;  %v1319_v27 = vpop.f32.mrb[23].mxu0  ;;  %v3326_v25 = vld [vmem:[%s4304_s12 + $0x20] sm:$0xff]  }
 0x314   : > { %3380 = vpow.bf16 %v1404_v24  ;;  %v1365_v28 = vpack.c.bf16 %v1319_v27, %v1316_v23 }
 0x315   : > { %v3920_v29 = vadd.bf16 %v3913_v12, %v1366_v26 }
 0x316   : > { %v1381_v30 = vadd.bf16 %v3913_v12, %v1365_v28 }
 0x317   : > { %v1398_v31 = vmin.bf16 %v3506_v8, %v3920_v29  ;;  %vm1390_vm4 = vcmp.gt.bf16.partialorder %v3920_v29, 0 }
 0x318   : > { %v1397_v32 = vmin.bf16 %v3506_v8, %v1381_v30  ;;  %v3085_v33 = vpop.f32.mrb[24].mxu0  ;;  %vm1389_vm3 = vcmp.gt.bf16.partialorder %v1381_v30, 0 }
 0x319   : > { %v1413_v34 = vmul.bf16 1069105081, %v1398_v31  ;;  %v1332_v35 = vpop.f32.mrb[25].mxu0 }
 0x31a   : > { %v1410_v37 = vmul.bf16 1069105081, %v1397_v32  ;;  %v3086_v38 = vpop.f32.mrb[26].mxu0 }
 0x31b   : > { %3382 = vpow.bf16 %v1413_v34  ;;  %v1368_v39 = vpack.c.bf16 %v3086_v38, %v3085_v33  ;;  %v1335_v40 = vpop.f32.mrb[27].mxu0  ;;  %v3327_v38 = vld [vmem:[%s4304_s12 + $0x28] sm:$0xff]  }
 0x31c   : > { %3384 = vpow.bf16 %v1410_v37  ;;  %v1367_v41 = vpack.c.bf16 %v1335_v40, %v1332_v35 }
 0x31d   : > { %v3927_v42 = vadd.bf16 %v3913_v12, %v1368_v39 }
 0x31e   : > { %v3379_v43 = vpop.eup %3378  ;;  %v3930_v44 = vadd.bf16 %v3913_v12, %v1367_v41 }
 0x31f   : > { %v3381_v45 = vpop.eup %3380  ;;  %v1400_v46 = vmin.bf16 %v3506_v8, %v3927_v42  ;;  %v1428_v47 = vsub.bf16 %v3379_v43, %v3507_v36  ;;  %vm1392_vm6 = vcmp.gt.bf16.partialorder %v3927_v42, 0 }
 0x320   : > { %v1399_v48 = vmin.bf16 %v3506_v8, %v3930_v44  ;;  %v3089_v49 = vpop.f32.mrb[28].mxu0  ;;  %v1427_v50 = vsub.bf16 %v3381_v45, %v3507_v36  ;;  %vm1391_vm5 = vcmp.gt.bf16.partialorder %v3930_v44, 0 }
 0x321   : > { %v1419_v51 = vmul.bf16 1069105081, %v1400_v46  ;;  %v1348_v52 = vpop.f32.mrb[29].mxu0  ;;  %v1436_v60 = vsel %vm1388_vm2, %v1380_v17, %v1428_v47  ;;  %v3325_v17 = vld [vmem:[%s4304_s12 + $0x18] sm:$0xff]   ;;  %v3328_v47 = vld [vmem:[%s4304_s12 + $0x30] sm:$0xff]  }
 0x322   : > { %v1416_v54 = vmul.bf16 1069105081, %v1399_v48  ;;  %v3090_v55 = vpop.f32.mrb[30].mxu0  ;;  %v1435_v56 = vsel %vm1387_vm1, %v1379_v19, %v1427_v50 }
 0x323   : > { %3386 = vpow.bf16 %v1419_v51  ;;  %v1370_v58 = vpack.c.bf16 %v3090_v55, %v3089_v49  ;;  %v1351_v59 = vpop.f32.mrb[31].mxu0  ;;  %3107 = vmatprep.mubr.bf16.mxu1 %v1435_v56 }
 0x324   : > { %3388 = vpow.bf16 %v1416_v54  ;;  %v1369_v61 = vpack.c.bf16 %v1351_v59, %v1348_v52  ;;  %3108 = vmatmul.mubr.bf16.vlgmr.msra.gmra.mrb[16].mxu1 %v1436_v60 }
 0x325   : > { %v3945_v63 = vadd.bf16 %v3913_v12, %v1370_v58  ;;  %3148 = vmatpush3.bf16.msra.mxu1 %v3906_v6  ;;  %v3329_v58 = vld [vmem:[%s4304_s12 + $0x38] sm:$0xff]  }
 0x326   : > { %v3383_v1 = vpop.eup %3382  ;;  %v3949_v2 = vadd.bf16 %v3913_v12, %v1369_v61  ;;  %3149 = vmatprep.subr.bf16.mxu1 %v3323_v53 }
 0x327   : > { %v3385_v4 = vpop.eup %3384  ;;  %v1402_v5 = vmin.bf16 %v3506_v8, %v3945_v63  ;;  %v1430_v7 = vsub.bf16 %v3383_v1, %v3507_v36  ;;  %vm1394_vm8 = vcmp.gt.bf16.partialorder %v3945_v63, 0 }
 0x328   : > { %v1401_v9 = vmin.bf16 %v3506_v8, %v3949_v2  ;;  %v3133_v6 = vpop.f32.mrb[32].mxu0  ;;  %v1429_v10 = vsub.bf16 %v3385_v4, %v3507_v36  ;;  %vm1393_vm7 = vcmp.gt.bf16.partialorder %v3949_v2, 0 }
 0x329   : > { %v1425_v11 = vmul.bf16 1069105081, %v1402_v5  ;;  %3150 = vmatpush3.bf16.msra.mxu1 %v3323_v53  ;;  %v1743_v12 = vpop.f32.mrb[33].mxu0  ;;  %v1438_v21 = vsel %vm1390_vm4, %v3920_v29, %v1430_v7 }
 0x32a   : > { %v1422_v14 = vmul.bf16 1069105081, %v1401_v9  ;;  %v3134_v15 = vpop.f32.mrb[34].mxu0  ;;  %v1437_v16 = vsel %vm1389_vm3, %v1381_v30, %v1429_v10  ;;  %3151 = vmatprep.subr.bf16.mxu1 %v3324_v3 }
 0x32b   : > { %3390 = vpow.bf16 %v1425_v11  ;;  %v1807_v19 = vpack.c.bf16 %v3134_v15, %v3133_v6  ;;  %3111 = vmatprep.mubr.bf16.mxu1 %v1437_v16  ;;  %v1746_v20 = vpop.f32.mrb[35].mxu0 }
 0x32c   : > { %3392 = vpow.bf16 %v1422_v14  ;;  %v1806_v18 = vpack.c.bf16 %v1746_v20, %v1743_v12  ;;  %3112 = vmatmul.mubr.bf16.gmra.mrb[20].mxu1 %v1438_v21 }
 0x32d   : > { %v3969_v22 = vadd.bf16 %v3961_v13, %v1807_v19  ;;  %3152 = vmatpush3.bf16.msra.mxu1 %v3324_v3 }
 0x32e   : > { %v3387_v23 = vpop.eup %3386  ;;  %v3972_v24 = vadd.bf16 %v3961_v13, %v1806_v18  ;;  %3153 = vmatprep.subr.bf16.mxu1 %v3325_v17 }
 0x32f   : > { %v3389_v26 = vpop.eup %3388  ;;  %v1839_v27 = vmin.bf16 %v3506_v8, %v3969_v22  ;;  %v1432_v28 = vsub.bf16 %v3387_v23, %v3507_v36  ;;  %vm1831_vm10 = vcmp.gt.bf16.partialorder %v3969_v22, 0 }
 0x330   : > { %v1838_v29 = vmin.bf16 %v3506_v8, %v3972_v24  ;;  %v3137_v30 = vpop.f32.mrb[36].mxu0  ;;  %v1431_v31 = vsub.bf16 %v3389_v26, %v3507_v36  ;;  %vm1830_vm9 = vcmp.gt.bf16.partialorder %v3972_v24, 0 }
 0x331   : > { %v1850_v32 = vmul.bf16 1069105081, %v1839_v27  ;;  %3154 = vmatpush3.bf16.msra.mxu1 %v3325_v17  ;;  %v1759_v33 = vpop.f32.mrb[37].mxu0  ;;  %v1440_v41 = vsel %vm1392_vm6, %v3927_v42, %v1432_v28 }
 0x332   : > { %v1847_v34 = vmul.bf16 1069105081, %v1838_v29  ;;  %v3138_v35 = vpop.f32.mrb[38].mxu0  ;;  %v1439_v37 = vsel %vm1391_vm5, %v3930_v44, %v1431_v31  ;;  %3155 = vmatprep.subr.bf16.mxu1 %v3326_v25 }
 0x333   : > { %3394 = vpow.bf16 %v1850_v32  ;;  %v1809_v39 = vpack.c.bf16 %v3138_v35, %v3137_v30  ;;  %3115 = vmatprep.mubr.bf16.mxu1 %v1439_v37  ;;  %v1762_v40 = vpop.f32.mrb[39].mxu0 }
 0x334   : > { %3396 = vpow.bf16 %v1847_v34  ;;  %v1808_v43 = vpack.c.bf16 %v1762_v40, %v1759_v33  ;;  %3116 = vmatmul.mubr.bf16.gmra.mrb[24].mxu1 %v1440_v41 }
 0x335   : > { %v3991_v45 = vadd.bf16 %v3961_v13, %v1809_v39  ;;  %3156 = vmatpush3.bf16.msra.mxu1 %v3326_v25 }
 0x336   : > { %v3391_v44 = vpop.eup %3390  ;;  %v3994_v46 = vadd.bf16 %v3961_v13, %v1808_v43  ;;  %3157 = vmatprep.subr.bf16.mxu1 %v3327_v38 }
 0x337   : > { %v3393_v48 = vpop.eup %3392  ;;  %v1841_v42 = vmin.bf16 %v3506_v8, %v3991_v45  ;;  %v1434_v49 = vsub.bf16 %v3391_v44, %v3507_v36  ;;  %vm1833_vm12 = vcmp.gt.bf16.partialorder %v3991_v45, 0  ;;  %v3330_v44 = vld [vmem:[%s4306_s14] sm:$0xff]  }
 0x338   : > { %v1840_v50 = vmin.bf16 %v3506_v8, %v3994_v46  ;;  %v3141_v51 = vpop.f32.mrb[40].mxu0  ;;  %v1433_v52 = vsub.bf16 %v3393_v48, %v3507_v36  ;;  %vm1832_vm11 = vcmp.gt.bf16.partialorder %v3994_v46, 0  ;;  %3179 = vmatprep.subr.bf16.mxu0 %v3330_v44  ;;  %v3333_v48 = vld [vmem:[%s4306_s14 + $0x18] sm:$0xff]  }
 0x339   : > { %v1856_v53 = vmul.bf16 1069105081, %v1841_v42  ;;  %3158 = vmatpush3.bf16.msra.mxu1 %v3327_v38  ;;  %v1775_v54 = vpop.f32.mrb[41].mxu0  ;;  %v1442_v61 = vsel %vm1394_vm8, %v3945_v63, %v1434_v49  ;;  %3180 = vmatpush3.bf16.msra.mxu0 %v3330_v44  ;;  %v3334_v42 = vld [vmem:[%s4306_s14 + $0x20] sm:$0xff]   ;;  %v3335_v49 = vld [vmem:[%s4306_s14 + $0x28] sm:$0xff]  }
 0x33a   : > { %v1853_v55 = vmul.bf16 1069105081, %v1840_v50  ;;  %v3142_v56 = vpop.f32.mrb[42].mxu0  ;;  %v1441_v57 = vsel %vm1393_vm7, %v3949_v2, %v1433_v52  ;;  %3159 = vmatprep.subr.bf16.mxu1 %v3328_v47  ;;  %v3336_v50 = vld [vmem:[%s4306_s14 + $0x30] sm:$0xff]   ;;  %v3338_v52 = vld [vmem:[%s4308_s16] sm:$0xff]  }
 0x33b   : > { %3398 = vpow.bf16 %v1856_v53  ;;  %v1811_v59 = vpack.c.bf16 %v3142_v56, %v3141_v51  ;;  %3119 = vmatprep.mubr.bf16.mxu1 %v1441_v57  ;;  %v1778_v60 = vpop.f32.mrb[43].mxu0  ;;  %v3337_v51 = vld [vmem:[%s4306_s14 + $0x38] sm:$0xff]   ;;  %v3339_v53 = vld [vmem:[%s4308_s16 + $0x8] sm:$0xff]  }
 0x33c   : > { %3400 = vpow.bf16 %v1853_v55  ;;  %v1810_v0 = vpack.c.bf16 %v1778_v60, %v1775_v54  ;;  %3120 = vmatmul.mubr.bf16.gmra.mrb[28].mxu1 %v1442_v61 }
 0x33d   : > { %v1827_v1 = vadd.bf16 %v3961_v13, %v1811_v59  ;;  %3160 = vmatpush3.bf16.msra.mxu1 %v3328_v47  ;;  %v3332_v47 = vld [vmem:[%s4306_s14 + $0x10] sm:$0xff]  }
 0x33e   : > { %v3395_v2 = vpop.eup %3394  ;;  %v1826_v3 = vadd.bf16 %v3961_v13, %v1810_v0  ;;  %3161 = vmatprep.subr.bf16.mxu1 %v3329_v58 }
 0x33f   : > { %v3397_v4 = vpop.eup %3396  ;;  %v1843_v5 = vmin.bf16 %v3506_v8, %v1827_v1  ;;  %v1871_v7 = vsub.bf16 %v3395_v2, %v3507_v36  ;;  %vm1835_vm14 = vcmp.gt.bf16.partialorder %v1827_v1, 0 }
 0x340   : > { %v1842_v9 = vmin.bf16 %v3506_v8, %v1826_v3  ;;  %v3145_v6 = vpop.f32.mrb[44].mxu0  ;;  %v1870_v63 = vsub.bf16 %v3397_v4, %v3507_v36  ;;  %vm1834_vm13 = vcmp.gt.bf16.partialorder %v1826_v3, 0 }
 0x341   : > { %v1862_v10 = vmul.bf16 1069105081, %v1843_v5  ;;  %3162 = vmatpush3.bf16.msra.mxu1 %v3329_v58  ;;  %v1791_v11 = vpop.f32.mrb[45].mxu0  ;;  %v1879_v19 = vsel %vm1831_vm10, %v3969_v22, %v1871_v7 }
 0x342   : > { %v1859_v12 = vmul.bf16 1069105081, %v1842_v9  ;;  %v3146_v14 = vpop.f32.mrb[46].mxu0  ;;  %v1878_v15 = vsel %vm1830_vm9, %v3972_v24, %v1870_v63  ;;  %3211 = vmatprep.subr.bf16.mxu1 %v3338_v52 }
 0x343   : > { %3402 = vpow.bf16 %v1862_v10  ;;  %v1813_v16 = vpack.c.bf16 %v3146_v14, %v3145_v6  ;;  %v1794_v17 = vpop.f32.mrb[47].mxu0  ;;  %3163 = vmatprep.mubr.bf16.mxu1 %v1878_v15  ;;  %v2055_v14 = vld [vmem:[%s4305_s13] sm:$0x1] }
 0x344   : > { %3404 = vpow.bf16 %v1859_v12  ;;  %v1812_v20 = vpack.c.bf16 %v1794_v17, %v1791_v11  ;;  %3164 = vmatmul.mubr.bf16.vlgmr.msra.gmra.mrb[32].mxu1 %v1879_v19  ;;  %v2057_v19 = vpack.i.b16 %v2055_v14, %v2055_v14 }
 0x345   : > { %v1829_v21 = vadd.bf16 %v3961_v13, %v1813_v16  ;;  %3212 = vmatpush3.bf16.msra.mxu1 %v3338_v52 }
 0x346   : > { %v3399_v18 = vpop.eup %3398  ;;  %v1828_v23 = vadd.bf16 %v3961_v13, %v1812_v20  ;;  %3213 = vmatprep.subr.bf16.mxu1 %v3339_v53 }
 0x347   : > { %v3401_v25 = vpop.eup %3400  ;;  %v1845_v26 = vmin.bf16 %v3506_v8, %v1829_v21  ;;  %v1873_v27 = vsub.bf16 %v3399_v18, %v3507_v36  ;;  %vm1837_vm1 = vcmp.gt.bf16.partialorder %v1829_v21, 0  ;;  %v2062_v18 = vrot.slane %v2057_v19, %v3760_v62 }
 0x348   : > { %v1844_v24 = vmin.bf16 %v3506_v8, %v1828_v23  ;;  %v1872_v28 = vsub.bf16 %v3401_v25, %v3507_v36  ;;  %vm1836_vm15 = vcmp.gt.bf16.partialorder %v1828_v23, 0 }
 0x349   : > { %v1868_v29 = vmul.bf16 1069105081, %v1845_v26  ;;  %v1881_v13 = vsel %vm1833_vm12, %v3991_v45, %v1873_v27  ;;  %3214 = vmatpush3.bf16.msra.mxu1 %v3339_v53 }
 0x34a   : > { %v1865_v22 = vmul.bf16 1069105081, %v1844_v24  ;;  %v1880_v30 = vsel %vm1832_vm11, %v3994_v46, %v1872_v28  ;;  %v3331_v46 = vld [vmem:[%s4306_s14 + $0x8] sm:$0xff]  }
 0x34b   : > { %3406 = vpow.bf16 %v1868_v29  ;;  %3167 = vmatprep.mubr.bf16.mxu1 %v1880_v30  ;;  %3181 = vmatprep.subr.bf16.mxu0 %v3331_v46 }
 0x34c   : > { %3408 = vpow.bf16 %v1865_v22  ;;  %3168 = vmatmul.mubr.bf16.gmra.mrb[36].mxu1 %v1881_v13  ;;  %3182 = vmatpush3.bf16.msra.mxu0 %v3331_v46 }
 0x34d   : > { %3183 = vmatprep.subr.bf16.mxu0 %v3332_v47 }
 0x34e   : > { %v3403_v31 = vpop.eup %3402 }
 0x34f   : > { %v3405_v32 = vpop.eup %3404  ;;  %v1875_v33 = vsub.bf16 %v3403_v31, %v3507_v36 }
 0x350   : > { %v1874_v34 = vsub.bf16 %v3405_v32, %v3507_v36  ;;  %3184 = vmatpush3.bf16.msra.mxu0 %v3332_v47 }
 0x351   : > { %v1883_v37 = vsel %vm1835_vm14, %v1827_v1, %v1875_v33  ;;  %3185 = vmatprep.subr.bf16.mxu0 %v3333_v48 }
 0x352   : > { %v1882_v35 = vsel %vm1834_vm13, %v1826_v3, %v1874_v34 }
 0x353   : > { %3171 = vmatprep.mubr.bf16.mxu1 %v1882_v35 }
 0x354   : > { %3172 = vmatmul.mubr.bf16.gmra.mrb[40].mxu1 %v1883_v37  ;;  %3186 = vmatpush3.bf16.msra.mxu0 %v3333_v48 }
 0x355   : > { %3187 = vmatprep.subr.bf16.mxu0 %v3334_v42 }
 0x356   : > { %v3407_v38 = vpop.eup %3406 }
 0x357   : > { %v3409_v39 = vpop.eup %3408  ;;  %v1877_v40 = vsub.bf16 %v3407_v38, %v3507_v36 }
 0x358   : > { %v1876_v41 = vsub.bf16 %v3409_v39, %v3507_v36  ;;  %3188 = vmatpush3.bf16.msra.mxu0 %v3334_v42 }
 0x359   : > { %v1885_v45 = vsel %vm1837_vm1, %v1829_v21, %v1877_v40  ;;  %3189 = vmatprep.subr.bf16.mxu0 %v3335_v49 }
 0x35a   : > { %v1884_v43 = vsel %vm1836_vm15, %v1828_v23, %v1876_v41 }
 0x35b   : > { %3175 = vmatprep.mubr.bf16.mxu1 %v1884_v43 }
 0x35c   : > { %3176 = vmatmul.mubr.bf16.gmra.mrb[44].mxu1 %v1885_v45  ;;  %3190 = vmatpush3.bf16.msra.mxu0 %v3335_v49 }
 0x35d   : > { %3191 = vmatprep.subr.bf16.mxu0 %v3336_v50 }
 0x360   : > { %3192 = vmatpush3.bf16.msra.mxu0 %v3336_v50 }
 0x361   : > { %3193 = vmatprep.subr.bf16.mxu0 %v3337_v51 }
 0x364   : > { %3194 = vmatpush3.bf16.msra.mxu0 %v3337_v51 }
 0x3f7   : > { %v4066_v54 = vpop.f32.mrb[16].mxu1 }
 0x3f8   : > { %v4068_v55 = vpop.f32.mrb[17].mxu1 }
 0x3f9   : > { %v4070_v56 = vpop.f32.mrb[18].mxu1 }
 0x3fa   : > { %v1605_v57 = vpack.c.bf16 %v4070_v56, %v4066_v54  ;;  %v4074_v58 = vpop.f32.mrb[19].mxu1 }
 0x3fb   : > { %v1604_v59 = vpack.c.bf16 %v4074_v58, %v4068_v55 }
 0x3ff   : > { %v4078_v60 = vpop.f32.mrb[20].mxu1 }
 0x400   : > { %v4080_v61 = vpop.f32.mrb[21].mxu1 }
 0x401   : > { %v4082_v0 = vpop.f32.mrb[22].mxu1 }
 0x402   : > { %v1607_v1 = vpack.c.bf16 %v4082_v0, %v4078_v60  ;;  %v4086_v2 = vpop.f32.mrb[23].mxu1 }
 0x403   : > { %v1606_v3 = vpack.c.bf16 %v4086_v2, %v4080_v61 }
 0x407   : > { %v4090_v4 = vpop.f32.mrb[24].mxu1 }
 0x408   : > { %v4092_v5 = vpop.f32.mrb[25].mxu1 }
 0x409   : > { %v4094_v7 = vpop.f32.mrb[26].mxu1 }
 0x40a   : > { %v1609_v9 = vpack.c.bf16 %v4094_v7, %v4090_v4  ;;  %v4098_v6 = vpop.f32.mrb[27].mxu1 }
 0x40b   : > { %v1608_v63 = vpack.c.bf16 %v4098_v6, %v4092_v5 }
 0x40f   : > { %v4102_v10 = vpop.f32.mrb[28].mxu1 }
 0x410   : > { %v4104_v11 = vpop.f32.mrb[29].mxu1 }
 0x411   : > { %v4106_v12 = vpop.f32.mrb[30].mxu1 }
 0x412   : > { %v1611_v15 = vpack.c.bf16 %v4106_v12, %v4102_v10  ;;  %v4113_v16 = vpop.f32.mrb[31].mxu1 }
 0x413   : > { %v1610_v17 = vpack.c.bf16 %v4113_v16, %v4104_v11 }
 0x417   : > { %v3165_v20 = vpop.f32.mrb[32].mxu1 }
 0x418   : > { %v1984_v21 = vpop.f32.mrb[33].mxu1 }
 0x419   : > { %v3166_v23 = vpop.f32.mrb[34].mxu1 }
 0x41a   : > { %v2048_v25 = vpack.c.bf16 %v3166_v23, %v3165_v20  ;;  %v1987_v26 = vpop.f32.mrb[35].mxu1 }
 0x41b   : > { %v2047_v27 = vpack.c.bf16 %v1987_v26, %v1984_v21 }
 0x41c   : > { %v2064_v24 = vadd.bf16 %v2062_v18, %v2048_v25 }
 0x41d   : > { %v2063_v28 = vadd.bf16 %v2062_v18, %v2047_v27 }
 0x41e   : > { %v2080_v29 = vmin.bf16 %v3506_v8, %v2064_v24  ;;  %vm2072_vm3 = vcmp.gt.bf16.partialorder %v2064_v24, 0 }
 0x41f   : > { %v2079_v22 = vmin.bf16 %v3506_v8, %v2063_v28  ;;  %v3169_v30 = vpop.f32.mrb[36].mxu1  ;;  %vm2071_vm2 = vcmp.gt.bf16.partialorder %v2063_v28, 0 }
 0x420   : > { %v2091_v13 = vmul.bf16 1069105081, %v2080_v29  ;;  %v2000_v31 = vpop.f32.mrb[37].mxu1 }
 0x421   : > { %v2088_v32 = vmul.bf16 1069105081, %v2079_v22  ;;  %v3170_v33 = vpop.f32.mrb[38].mxu1 }
 0x422   : > { %3410 = vpow.bf16 %v2091_v13  ;;  %v2050_v34 = vpack.c.bf16 %v3170_v33, %v3169_v30  ;;  %v2003_v35 = vpop.f32.mrb[39].mxu1 }
 0x423   : > { %3412 = vpow.bf16 %v2088_v32  ;;  %v2049_v37 = vpack.c.bf16 %v2003_v35, %v2000_v31 }
 0x424   : > { %v2066_v38 = vadd.bf16 %v2062_v18, %v2050_v34 }
 0x425   : > { %v2065_v39 = vadd.bf16 %v2062_v18, %v2049_v37 }
 0x426   : > { %v2082_v40 = vmin.bf16 %v3506_v8, %v2066_v38  ;;  %vm2074_vm5 = vcmp.gt.bf16.partialorder %v2066_v38, 0 }
 0x427   : > { %v2081_v41 = vmin.bf16 %v3506_v8, %v2065_v39  ;;  %v3173_v43 = vpop.f32.mrb[40].mxu1  ;;  %vm2073_vm4 = vcmp.gt.bf16.partialorder %v2065_v39, 0 }
 0x428   : > { %v2097_v45 = vmul.bf16 1069105081, %v2082_v40  ;;  %v2016_v44 = vpop.f32.mrb[41].mxu1 }
 0x429   : > { %v2094_v46 = vmul.bf16 1069105081, %v2081_v41  ;;  %v3174_v47 = vpop.f32.mrb[42].mxu1 }
 0x42a   : > { %3414 = vpow.bf16 %v2097_v45  ;;  %v2052_v48 = vpack.c.bf16 %v3174_v47, %v3173_v43  ;;  %v2019_v42 = vpop.f32.mrb[43].mxu1 }
 0x42b   : > { %3416 = vpow.bf16 %v2094_v46  ;;  %v2051_v49 = vpack.c.bf16 %v2019_v42, %v2016_v44 }
 0x42c   : > { %v2068_v50 = vadd.bf16 %v2062_v18, %v2052_v48 }
 0x42d   : > { %v3411_v51 = vpop.eup %3410  ;;  %v2067_v52 = vadd.bf16 %v2062_v18, %v2051_v49 }
 0x42e   : > { %v3413_v53 = vpop.eup %3412  ;;  %v2084_v14 = vmin.bf16 %v3506_v8, %v2068_v50  ;;  %v2112_v19 = vsub.bf16 %v3411_v51, %v3507_v36  ;;  %vm2076_vm7 = vcmp.gt.bf16.partialorder %v2068_v50, 0 }
 0x42f   : > { %v2083_v20 = vmin.bf16 %v3506_v8, %v2067_v52  ;;  %v3177_v21 = vpop.f32.mrb[44].mxu1  ;;  %v2111_v23 = vsub.bf16 %v3413_v53, %v3507_v36  ;;  %vm2075_vm6 = vcmp.gt.bf16.partialorder %v2067_v52, 0 }
 0x430   : > { %v2103_v25 = vmul.bf16 1069105081, %v2084_v14  ;;  %v2032_v26 = vpop.f32.mrb[45].mxu1  ;;  %v2120_v31 = vsel %vm2072_vm3, %v2064_v24, %v2112_v19 }
 0x431   : > { %v2100_v27 = vmul.bf16 1069105081, %v2083_v20  ;;  %v3178_v29 = vpop.f32.mrb[46].mxu1  ;;  %v2119_v22 = vsel %vm2071_vm2, %v2063_v28, %v2111_v23  ;;  %v3343_v23 = vld [vmem:[%s4308_s16 + $0x28] sm:$0xff]  }
 0x432   : > { %3418 = vpow.bf16 %v2103_v25  ;;  %v2054_v30 = vpack.c.bf16 %v3178_v29, %v3177_v21  ;;  %v2035_v13 = vpop.f32.mrb[47].mxu1  ;;  %3195 = vmatprep.mubr.bf16.mxu0 %v2119_v22  ;;  %v3342_v21 = vld [vmem:[%s4308_s16 + $0x20] sm:$0xff]   ;;  %v3344_v25 = vld [vmem:[%s4308_s16 + $0x30] sm:$0xff]  }
 0x433   : > { %3420 = vpow.bf16 %v2100_v27  ;;  %v2053_v32 = vpack.c.bf16 %v2035_v13, %v2032_v26  ;;  %3196 = vmatmul.mubr.bf16.vlgmr.msra.gmra.mrb[48].mxu0 %v2120_v31  ;;  %v3345_v26 = vld [vmem:[%s4308_s16 + $0x38] sm:$0xff]   ;;  %v2296_v27 = vld [vmem:[%s4307_s15] sm:$0x1] }
 0x434   : > { %v2070_v33 = vadd.bf16 %v2062_v18, %v2054_v30  ;;  %v2298_v29 = vpack.i.b16 %v2296_v27, %v2296_v27 }
 0x435   : > { %v3415_v34 = vpop.eup %3414  ;;  %v2069_v35 = vadd.bf16 %v2062_v18, %v2053_v32 }
 0x436   : > { %v3417_v37 = vpop.eup %3416  ;;  %v2086_v40 = vmin.bf16 %v3506_v8, %v2070_v33  ;;  %v2114_v41 = vsub.bf16 %v3415_v34, %v3507_v36  ;;  %vm2078_vm9 = vcmp.gt.bf16.partialorder %v2070_v33, 0  ;;  %v2303_v13 = vrot.slane %v2298_v29, %v3760_v62 }
 0x437   : > { %v2085_v43 = vmin.bf16 %v3506_v8, %v2069_v35  ;;  %v2113_v28 = vsub.bf16 %v3417_v37, %v3507_v36  ;;  %vm2077_vm8 = vcmp.gt.bf16.partialorder %v2069_v35, 0 }
 0x438   : > { %v2109_v45 = vmul.bf16 1069105081, %v2086_v40  ;;  %v2122_v24 = vsel %vm2074_vm5, %v2066_v38, %v2114_v41 }
 0x439   : > { %v2106_v44 = vmul.bf16 1069105081, %v2085_v43  ;;  %v2121_v46 = vsel %vm2073_vm4, %v2065_v39, %v2113_v28 }
 0x43a   : > { %3422 = vpow.bf16 %v2109_v45  ;;  %3199 = vmatprep.mubr.bf16.mxu0 %v2121_v46 }
 0x43b   : > { %3424 = vpow.bf16 %v2106_v44  ;;  %3200 = vmatmul.mubr.bf16.gmra.mrb[52].mxu0 %v2122_v24 }
 0x43d   : > { %v3419_v18 = vpop.eup %3418 }
 0x43e   : > { %v3421_v47 = vpop.eup %3420  ;;  %v2116_v48 = vsub.bf16 %v3419_v18, %v3507_v36 }
 0x43f   : > { %v2115_v42 = vsub.bf16 %v3421_v47, %v3507_v36 }
 0x440   : > { %v2124_v51 = vsel %vm2076_vm7, %v2068_v50, %v2116_v48  ;;  %v3341_v50 = vld [vmem:[%s4308_s16 + $0x18] sm:$0xff]  }
 0x441   : > { %v2123_v49 = vsel %vm2075_vm6, %v2067_v52, %v2115_v42  ;;  %v3340_v52 = vld [vmem:[%s4308_s16 + $0x10] sm:$0xff]  }
 0x442   : > { %3203 = vmatprep.mubr.bf16.mxu0 %v2123_v49  ;;  %3215 = vmatprep.subr.bf16.mxu1 %v3340_v52 }
 0x443   : > { %3204 = vmatmul.mubr.bf16.gmra.mrb[56].mxu0 %v2124_v51  ;;  %3216 = vmatpush3.bf16.msra.mxu1 %v3340_v52 }
 0x444   : > { %3217 = vmatprep.subr.bf16.mxu1 %v3341_v50 }
 0x445   : > { %v3423_v53 = vpop.eup %3422 }
 0x446   : > { %v3425_v39 = vpop.eup %3424  ;;  %v2118_v14 = vsub.bf16 %v3423_v53, %v3507_v36 }
 0x447   : > { %v2117_v38 = vsub.bf16 %v3425_v39, %v3507_v36  ;;  %3218 = vmatpush3.bf16.msra.mxu1 %v3341_v50 }
 0x448   : > { %v2126_v20 = vsel %vm2078_vm9, %v2070_v33, %v2118_v14  ;;  %3219 = vmatprep.subr.bf16.mxu1 %v3342_v21 }
 0x449   : > { %v2125_v19 = vsel %vm2077_vm8, %v2069_v35, %v2117_v38 }
 0x44a   : > { %3207 = vmatprep.mubr.bf16.mxu0 %v2125_v19 }
 0x44b   : > { %3208 = vmatmul.mubr.bf16.gmra.mrb[60].mxu0 %v2126_v20  ;;  %3220 = vmatpush3.bf16.msra.mxu1 %v3342_v21 }
 0x44c   : > { %3221 = vmatprep.subr.bf16.mxu1 %v3343_v23 }
 0x44f   : > { %3222 = vmatpush3.bf16.msra.mxu1 %v3343_v23 }
 0x450   : > { %3223 = vmatprep.subr.bf16.mxu1 %v3344_v25 }
 0x453   : > { %3224 = vmatpush3.bf16.msra.mxu1 %v3344_v25 }
 0x454   : > { %3225 = vmatprep.subr.bf16.mxu1 %v3345_v26 }
 0x457   : > { %3226 = vmatpush3.bf16.msra.mxu1 %v3345_v26 }
 0x506   : > { %v3197_v22 = vpop.f32.mrb[48].mxu0 }
 0x507   : > { %v2225_v30 = vpop.f32.mrb[49].mxu0 }
 0x508   : > { %v3198_v31 = vpop.f32.mrb[50].mxu0 }
 0x509   : > { %v2289_v32 = vpack.c.bf16 %v3198_v31, %v3197_v22  ;;  %v2228_v33 = vpop.f32.mrb[51].mxu0 }
 0x50a   : > { %v2288_v34 = vpack.c.bf16 %v2228_v33, %v2225_v30 }
 0x50b   : > { %v2305_v35 = vadd.bf16 %v2303_v13, %v2289_v32 }
 0x50c   : > { %v2304_v37 = vadd.bf16 %v2303_v13, %v2288_v34 }
 0x50d   : > { %v2321_v40 = vmin.bf16 %v3506_v8, %v2305_v35  ;;  %vm2313_vm11 = vcmp.gt.bf16.partialorder %v2305_v35, 0 }
 0x50e   : > { %v2320_v41 = vmin.bf16 %v3506_v8, %v2304_v37  ;;  %v3201_v43 = vpop.f32.mrb[52].mxu0  ;;  %vm2312_vm10 = vcmp.gt.bf16.partialorder %v2304_v37, 0 }
 0x50f   : > { %v2332_v28 = vmul.bf16 1069105081, %v2321_v40  ;;  %v2241_v45 = vpop.f32.mrb[53].mxu0 }
 0x510   : > { %v2329_v44 = vmul.bf16 1069105081, %v2320_v41  ;;  %v3202_v46 = vpop.f32.mrb[54].mxu0 }
 0x511   : > { %3426 = vpow.bf16 %v2332_v28  ;;  %v2291_v24 = vpack.c.bf16 %v3202_v46, %v3201_v43  ;;  %v2244_v18 = vpop.f32.mrb[55].mxu0 }
 0x512   : > { %3428 = vpow.bf16 %v2329_v44  ;;  %v2290_v47 = vpack.c.bf16 %v2244_v18, %v2241_v45 }
 0x513   : > { %v2307_v48 = vadd.bf16 %v2303_v13, %v2291_v24 }
 0x514   : > { %v2306_v42 = vadd.bf16 %v2303_v13, %v2290_v47 }
 0x515   : > { %v2323_v49 = vmin.bf16 %v3506_v8, %v2307_v48  ;;  %vm2315_vm13 = vcmp.gt.bf16.partialorder %v2307_v48, 0 }
 0x516   : > { %v2322_v51 = vmin.bf16 %v3506_v8, %v2306_v42  ;;  %v3205_v53 = vpop.f32.mrb[56].mxu0  ;;  %vm2314_vm12 = vcmp.gt.bf16.partialorder %v2306_v42, 0 }
 0x517   : > { %v2338_v39 = vmul.bf16 1069105081, %v2323_v49  ;;  %v2257_v14 = vpop.f32.mrb[57].mxu0 }
 0x518   : > { %v2335_v38 = vmul.bf16 1069105081, %v2322_v51  ;;  %v3206_v19 = vpop.f32.mrb[58].mxu0 }
 0x519   : > { %3430 = vpow.bf16 %v2338_v39  ;;  %v2293_v20 = vpack.c.bf16 %v3206_v19, %v3205_v53  ;;  %v2260_v52 = vpop.f32.mrb[59].mxu0 }
 0x51a   : > { %3432 = vpow.bf16 %v2335_v38  ;;  %v2292_v50 = vpack.c.bf16 %v2260_v52, %v2257_v14 }
 0x51b   : > { %v2309_v21 = vadd.bf16 %v2303_v13, %v2293_v20 }
 0x51c   : > { %v3427_v23 = vpop.eup %3426  ;;  %v2308_v25 = vadd.bf16 %v2303_v13, %v2292_v50 }
 0x51d   : > { %v3429_v26 = vpop.eup %3428  ;;  %v2325_v27 = vmin.bf16 %v3506_v8, %v2309_v21  ;;  %v2353_v29 = vsub.bf16 %v3427_v23, %v3507_v36  ;;  %vm2317_vm15 = vcmp.gt.bf16.partialorder %v2309_v21, 0 }
 0x51e   : > { %v2324_v22 = vmin.bf16 %v3506_v8, %v2308_v25  ;;  %v3209_v30 = vpop.f32.mrb[60].mxu0  ;;  %v2352_v31 = vsub.bf16 %v3429_v26, %v3507_v36  ;;  %vm2316_vm14 = vcmp.gt.bf16.partialorder %v2308_v25, 0 }
 0x51f   : > { %v2344_v32 = vmul.bf16 1069105081, %v2325_v27  ;;  %v2273_v33 = vpop.f32.mrb[61].mxu0  ;;  %v2361_v45 = vsel %vm2313_vm11, %v2305_v35, %v2353_v29 }
 0x520   : > { %v2341_v34 = vmul.bf16 1069105081, %v2324_v22  ;;  %v3210_v40 = vpop.f32.mrb[62].mxu0  ;;  %v2360_v41 = vsel %vm2312_vm10, %v2304_v37, %v2352_v31 }
 0x521   : > { %3434 = vpow.bf16 %v2344_v32  ;;  %v2295_v43 = vpack.c.bf16 %v3210_v40, %v3209_v30  ;;  %v2276_v28 = vpop.f32.mrb[63].mxu0  ;;  %3227 = vmatprep.mubr.bf16.mxu1 %v2360_v41 }
 0x522   : > { %3436 = vpow.bf16 %v2341_v34  ;;  %v2294_v44 = vpack.c.bf16 %v2276_v28, %v2273_v33  ;;  %3228 = vmatmul.mubr.bf16.vlgmr.msra.gmra.mrb[48].mxu1 %v2361_v45 }
 0x523   : > { %v2311_v46 = vadd.bf16 %v2303_v13, %v2295_v43 }
 0x524   : > { %v3431_v24 = vpop.eup %3430  ;;  %v2310_v18 = vadd.bf16 %v2303_v13, %v2294_v44 }
 0x525   : > { %v3433_v47 = vpop.eup %3432  ;;  %v2327_v49 = vmin.bf16 %v3506_v8, %v2311_v46  ;;  %v2355_v51 = vsub.bf16 %v3431_v24, %v3507_v36  ;;  %vm2319_vm2 = vcmp.gt.bf16.partialorder %v2311_v46, 0 }
 0x526   : > { %v2326_v53 = vmin.bf16 %v3506_v8, %v2310_v18  ;;  %v2354_v37 = vsub.bf16 %v3433_v47, %v3507_v36  ;;  %vm2318_vm1 = vcmp.gt.bf16.partialorder %v2310_v18, 0 }
 0x527   : > { %v2350_v39 = vmul.bf16 1069105081, %v2327_v49  ;;  %v2363_v35 = vsel %vm2315_vm13, %v2307_v48, %v2355_v51 }
 0x528   : > { %v2347_v14 = vmul.bf16 1069105081, %v2326_v53  ;;  %v2362_v38 = vsel %vm2314_vm12, %v2306_v42, %v2354_v37 }
 0x529   : > { %3438 = vpow.bf16 %v2350_v39  ;;  %3231 = vmatprep.mubr.bf16.mxu1 %v2362_v38 }
 0x52a   : > { %3440 = vpow.bf16 %v2347_v14  ;;  %3232 = vmatmul.mubr.bf16.gmra.mrb[52].mxu1 %v2363_v35 }
 0x52c   : > { %v3435_v13 = vpop.eup %3434 }
 0x52d   : > { %v3437_v19 = vpop.eup %3436  ;;  %v2357_v20 = vsub.bf16 %v3435_v13, %v3507_v36 }
 0x52e   : > { %v2356_v52 = vsub.bf16 %v3437_v19, %v3507_v36 }
 0x52f   : > { %v2365_v50 = vsel %vm2317_vm15, %v2309_v21, %v2357_v20 }
 0x530   : > { %v2364_v8 = vsel %vm2316_vm14, %v2308_v25, %v2356_v52  ;;  %v2537_v25 = vld [vmem:[%s4309_s17] sm:$0x1] }
 0x531   : > { %3235 = vmatprep.mubr.bf16.mxu1 %v2364_v8  ;;  %v2539_v22 = vpack.i.b16 %v2537_v25, %v2537_v25 }
 0x532   : > { %3236 = vmatmul.mubr.bf16.gmra.mrb[56].mxu1 %v2365_v50 }
 0x533   : > { %v2544_v31 = vrot.slane %v2539_v22, %v3760_v62 }
 0x534   : > { %v3439_v23 = vpop.eup %3438 }
 0x535   : > { %v3441_v42 = vpop.eup %3440  ;;  %v2359_v26 = vsub.bf16 %v3439_v23, %v3507_v36 }
 0x536   : > { %v2358_v48 = vsub.bf16 %v3441_v42, %v3507_v36 }
 0x537   : > { %v2367_v29 = vsel %vm2319_vm2, %v2311_v46, %v2359_v26  ;;  %v1612_v26 = vld [vmem:[%s4301_s9] sm:$0x1] }
 0x538   : > { %v2366_v27 = vsel %vm2318_vm1, %v2310_v18, %v2358_v48  ;;  %v1614_v48 = vpack.i.b16 %v1612_v26, %v1612_v26 }
 0x539   : > { %3239 = vmatprep.mubr.bf16.mxu1 %v2366_v27 }
 0x53a   : > { %3240 = vmatmul.mubr.bf16.gmra.mrb[60].mxu1 %v2367_v29  ;;  %v1619_v27 = vrot.slane %v1614_v48, %v3760_v62 }
 0x53c   : > { %v1621_v29 = vadd.bf16 %v1619_v27, %v1605_v57  ;;  %v1623_v55 = vadd.bf16 %v1619_v27, %v1607_v1  ;;  %v1624_v61 = vadd.bf16 %v1619_v27, %v1608_v63  ;;  %v1627_v5 = vadd.bf16 %v1619_v27, %v1611_v15 }
 0x53d   : > { %v1626_v7 = vadd.bf16 %v1619_v27, %v1610_v17 }
 0x5f5   : > { %v3229_v30 = vpop.f32.mrb[48].mxu1 }
 0x5f6   : > { %v2466_v21 = vpop.f32.mrb[49].mxu1 }
 0x5f7   : > { %v3230_v32 = vpop.f32.mrb[50].mxu1 }
 0x5f8   : > { %v2530_v33 = vpack.c.bf16 %v3230_v32, %v3229_v30  ;;  %v2469_v34 = vpop.f32.mrb[51].mxu1 }
 0x5f9   : > { %v2529_v40 = vpack.c.bf16 %v2469_v34, %v2466_v21  ;;  %v1622_v34 = vadd.bf16 %v1619_v27, %v1606_v3 }
 0x5fa   : > { %v2546_v36 = vadd.bf16 %v2544_v31, %v2530_v33 }
 0x5fb   : > { %v2545_v43 = vadd.bf16 %v2544_v31, %v2529_v40 }
 0x5fc   : > { %2563 = vrot.lane.b32.xlu0 %v2546_v36, %s4317_s29  ;;  %v1625_v36 = vadd.bf16 %v1619_v27, %v1609_v9 }
 0x5fd   : > { %v3233_v41 = vpop.f32.mrb[52].mxu1 }
 0x5fe   : > { %v2482_v28 = vpop.f32.mrb[53].mxu1 }
 0x5ff   : > { %v3234_v45 = vpop.f32.mrb[54].mxu1 }
 0x600   : > { %v2532_v44 = vpack.c.bf16 %v3234_v45, %v3233_v41  ;;  %2561 = vrot.lane.b32.xlu0 %v2545_v43, %s4317_s29  ;;  %v2485_v46 = vpop.f32.mrb[55].mxu1 }
 0x601   : > { %v2531_v24 = vpack.c.bf16 %v2485_v46, %v2482_v28 }
 0x602   : > { %v2548_v18 = vadd.bf16 %v2544_v31, %v2532_v44 }
 0x603   : > { %v2547_v49 = vadd.bf16 %v2544_v31, %v2531_v24 }
 0x604   : > { %2567 = vrot.lane.b32.xlu1 %v2548_v18, %s4317_s29 }
 0x605   : > { %v3237_v47 = vpop.f32.mrb[56].mxu1 }
 0x606   : > { %v2498_v51 = vpop.f32.mrb[57].mxu1 }
 0x607   : > { %v3238_v53 = vpop.f32.mrb[58].mxu1 }
 0x608   : > { %v2534_v37 = vpack.c.bf16 %v3238_v53, %v3237_v47  ;;  %2565 = vrot.lane.b32.xlu1 %v2547_v49, %s4317_s29  ;;  %v2501_v39 = vpop.f32.mrb[59].mxu1 }
 0x609   : > { %v2533_v14 = vpack.c.bf16 %v2501_v39, %v2498_v51 }
 0x60a   : > { %v2550_v38 = vadd.bf16 %v2544_v31, %v2534_v37 }
 0x60b   : > { %v2549_v35 = vadd.bf16 %v2544_v31, %v2533_v14 }
 0x60c   : > { %2571 = vrot.lane.b32.xlu1 %v2550_v38, %s4317_s29 }
 0x60d   : > { %2569 = vrot.lane.b32.xlu0 %v2549_v35, %s4317_s29  ;;  %v3241_v13 = vpop.f32.mrb[60].mxu1 }
 0x60e   : > { %v2514_v19 = vpop.f32.mrb[61].mxu1 }
 0x60f   : > { %v3242_v20 = vpop.f32.mrb[62].mxu1 }
 0x610   : > { %v2536_v52 = vpack.c.bf16 %v3242_v20, %v3241_v13  ;;  %v2517_v8 = vpop.f32.mrb[63].mxu1 }
 0x611   : > { %v2535_v50 = vpack.c.bf16 %v2517_v8, %v2514_v19 }
 0x612   : > { %v2552_v23 = vadd.bf16 %v2544_v31, %v2536_v52 }
 0x613   : > { %v2551_v42 = vadd.bf16 %v2544_v31, %v2535_v50  ;;  %v1620_v31 = vadd.bf16 %v1619_v27, %v1604_v59 }
 0x614   : > { %2575 = vrot.lane.b32.xlu1 %v2552_v23, %s4317_s29 }
 0x615   : > { %2573 = vrot.lane.b32.xlu0 %v2551_v42, %s4317_s29 }
 0x66e   : > { %v2564_v25 = vpop.permute.xlu0 %2563 }
 0x66f   : > { %v2582_v22 = vsel %vm1684_vm0, %v1621_v29, %v2564_v25 }
 0x670   : > { %v2849_v30 = vcombine.low %v2582_v22, %v2582_v22  ;;  %v2850_v21 = vcombine.high %v2582_v22, %v2582_v22 }
 0x672   : > { %2659 = vst [vmem:[%s4196_s21 + $0x8] sm:$0xf] %v2849_v30  ;;  %2660 = vst [vmem:[%s4196_s21 + $0xc] sm:$0xf] %v2850_v21  ;;  %v2562_v62 = vpop.permute.xlu0 %2561 }
 0x673   : > { %v2579_v54 = vsel %vm1684_vm0, %v1620_v31, %v2562_v62 }
 0x674   : > { %v2847_v56 = vcombine.low %v2579_v54, %v2579_v54  ;;  %v2848_v57 = vcombine.high %v2579_v54, %v2579_v54 }
 0x676   : > { %2657 = vst [vmem:[%s4196_s21] sm:$0xf] %v2847_v56  ;;  %2658 = vst [vmem:[%s4196_s21 + $0x4] sm:$0xf] %v2848_v57  ;;  %v2568_v58 = vpop.permute.xlu1 %2567 }
 0x677   : > { %v2588_v59 = vsel %vm1684_vm0, %v1623_v55, %v2568_v58 }
 0x678   : > { %v2853_v32 = vcombine.low %v2588_v59, %v2588_v59  ;;  %v2854_v33 = vcombine.high %v2588_v59, %v2588_v59 }
 0x67a   : > { %2663 = vst [vmem:[%s4196_s21 + $0x18] sm:$0xf] %v2853_v32  ;;  %2664 = vst [vmem:[%s4196_s21 + $0x1c] sm:$0xf] %v2854_v33  ;;  %v2566_v40 = vpop.permute.xlu1 %2565 }
 0x67b   : > { %v2585_v60 = vsel %vm1684_vm0, %v1622_v34, %v2566_v40 }
 0x67c   : > { %v2851_v0 = vcombine.low %v2585_v60, %v2585_v60  ;;  %v2852_v1 = vcombine.high %v2585_v60, %v2585_v60 }
 0x67e   : > { %2661 = vst [vmem:[%s4196_s21 + $0x10] sm:$0xf] %v2851_v0  ;;  %2662 = vst [vmem:[%s4196_s21 + $0x14] sm:$0xf] %v2852_v1  ;;  %v2572_v2 = vpop.permute.xlu1 %2571 }
 0x67f   : > { %v2594_v3 = vsel %vm1684_vm0, %v1625_v36, %v2572_v2  ;;  %v2570_v41 = vpop.permute.xlu0 %2569 }
 0x680   : > { %v2857_v43 = vcombine.low %v2594_v3, %v2594_v3  ;;  %v2858_v28 = vcombine.high %v2594_v3, %v2594_v3  ;;  %v2591_v45 = vsel %vm1684_vm0, %v1624_v61, %v2570_v41 }
 0x681   : > { %v2855_v44 = vcombine.low %v2591_v45, %v2591_v45  ;;  %v2856_v4 = vcombine.high %v2591_v45, %v2591_v45 }
 0x682   : > { %2667 = vst [vmem:[%s4196_s21 + $0x28] sm:$0xf] %v2857_v43  ;;  %2668 = vst [vmem:[%s4196_s21 + $0x2c] sm:$0xf] %v2858_v28 }
 0x683   : > { %2665 = vst [vmem:[%s4196_s21 + $0x20] sm:$0xf] %v2855_v44  ;;  %2666 = vst [vmem:[%s4196_s21 + $0x24] sm:$0xf] %v2856_v4 }
 0x686   : > { %v2576_v9 = vpop.permute.xlu1 %2575 }
 0x687   : > { %v2600_v6 = vsel %vm1684_vm0, %v1627_v5, %v2576_v9  ;;  %v2574_v63 = vpop.permute.xlu0 %2573 }
 0x688   : > { %v2861_v46 = vcombine.low %v2600_v6, %v2600_v6  ;;  %v2862_v24 = vcombine.high %v2600_v6, %v2600_v6  ;;  %v2597_v10 = vsel %vm1684_vm0, %v1626_v7, %v2574_v63 }
 0x689   : > { %v2859_v12 = vcombine.low %v2597_v10, %v2597_v10  ;;  %v2860_v11 = vcombine.high %v2597_v10, %v2597_v10 }
 0x68a   : > { %2671 = vst [vmem:[%s4196_s21 + $0x38] sm:$0xf] %v2861_v46  ;;  %2672 = vst [vmem:[%s4196_s21 + $0x3c] sm:$0xf] %v2862_v24 }
 0x68b   : > { %2669 = vst [vmem:[%s4196_s21 + $0x30] sm:$0xf] %v2859_v12  ;;  %2670 = vst [vmem:[%s4196_s21 + $0x34] sm:$0xf] %v2860_v11 }
 0x68c   : > { %3455 = shalt.err (!%p3452_p7)
}
 0x68d   : > { %s3456_s21 = scalar_lea.hbm %s4240_s0, 1024  ;;  %s3460_s30 = scalar_lea.hbm %s4310_s18, 2048 }
 0x68e   : > { %p3457_p10 = scmp.ne.s32.totalorder %s4240_s0, %s3456_s21  ;;  %p3461_p13 = scmp.lt.u32.totalorder %s4240_s0, %s4310_s18 }
 0x68f   : > { %p3462_p0 = scmp.lt.u32.totalorder %s3460_s30, %s3456_s21  ;;  %p3464_p2 = scmp.lt.u32.totalorder %s3456_s21, %s4240_s0 }
 0x690   : > { %p3458_p11 = pnand %p3457_p10, %p3645_p6 }
 0x691   : > { %p3463_p1 = por %p3462_p0, %p3461_p13 }
 0x692   : > { %p3459_p12 = pneg %p3458_p11 }
 0x693   : > { %p3465_p3 = por %p3464_p2, %p3463_p1 }
 0x695   : > { %p3466_p4 = pnand %p3465_p3, %p3459_p12 }
 0x697   : > { %3469 = shalt.err (!%p3466_p4)
}
 0x698   : > { %s3510_s28 = smov 4   ;;  %s4334_s22 = smov 64  }
 0x699   : > { %s4335_s3 = scalar_lea.sflag [#allocation4], %s3685_s26 }
 0x69a   : > { %3243 = dma.vmem_to_hbm [thread:$0]  (%p3645_p6), %s4242_s1, 1024, %s4240_s0, %s4335_s3, %s4334_s22, %s4334_s22, %s3510_s28  }
 0x69b PF: > { %s2702_s20 = sand.u32 1, %s3492_s27   ;;  %p3246_p5 = pnand %p2769_p9, %p3649_p8 }
 0x69c   : > { %s2703_s21 = scalar_lea.sflag [#allocation4], %s2702_s20 }
 0x69d   : > { %3487 = dma.done.wait (!%p3246_p5), %s2703_s21, 1024  }
 0x69e   : > { %3489 = vsyncadd (!%p3246_p5), %s2703_s21, 4294966272  ;;  %s4337_s30 = sld [smem:[#allocation9_spill]]  ;;  %s4338_s27 = sld [smem:[#allocation6_spill]] }
 0x69f   : > { %s4339_s28 = sld [smem:[#allocation7_spill]]  ;;  %s4340_s29 = sld [smem:[#allocation10_spill]] }
 0x6a4   : > { %p28_p7 = scmp.ge.s32.totalorder %s4337_s30, 4  }
 0x6a6   :  { %30 = sbr.rel (!%p28_p7) target bundleno = 8 (0x8), region = 173 }
 0x6ad   :  { %2708 = vsyncpa [#allocation4], 1 }
 0x6ae   :  { %2710 = vsyncpa [#allocation4 + $0x1], 1 }

</bundles_post_ra>
